<compile_context>
chip_gen: v6e
topology: v6e:2x2x1
jax: 0.10.0
libtpu: 0.0.40
codegen_flags: <defaults>
</compile_context>

<pallas_src>
import math

import jax
import jax.numpy as jnp
from jax.experimental import pallas as pl
from jax.experimental.pallas import tpu as pltpu

# ---------------- small synthetic T5-encoder config ----------------
BATCH = 2
SEQ = 8
D_MODEL = 32
HEADS = 4
HEAD_DIM = D_MODEL // HEADS          # inner_dim == d_model
D_FF = 64
LAYERS = 2
VOCAB = 100
REL_BUCKETS = 32
REL_MAX_DIST = 128
LN_EPS = 1e-6                        # T5 RMSNorm epsilon

BS = BATCH * SEQ
BH = BATCH * HEADS


# ---------------- in-kernel helpers ----------------
def _rms_norm(x, gamma, eps=LN_EPS):
    # T5 LayerNorm: RMS only — no mean subtraction, no bias.
    var = jnp.mean(jnp.square(x), axis=-1, keepdims=True)
    return x * jax.lax.rsqrt(var + eps) * gamma


def _split_heads(x):
    # (BS, D) -> (B*H, S, Dh): heads folded into a single leading batch axis.
    x = x.reshape(BATCH, SEQ, HEADS, HEAD_DIM)
    x = jnp.transpose(x, (0, 2, 1, 3))
    return x.reshape(BH, SEQ, HEAD_DIM)


def _merge_heads(x):
    # (B*H, S, Dh) -> (BS, D)
    x = x.reshape(BATCH, HEADS, SEQ, HEAD_DIM)
    x = jnp.transpose(x, (0, 2, 1, 3))
    return x.reshape(BS, D_MODEL)


# ---------------- fused encoder kernel (no grid; layers unrolled) ----------------
def _encoder_kernel(h0_ref, bias_ref, wqkv_ref, wo_ref, wi_ref, wff_ref,
                    ln1_ref, ln2_ref, lnf_ref, out_ref):
    h = h0_ref[...].astype(jnp.float32)        # (BS, D), VMEM-resident activation
    bias = bias_ref[...]                       # (B*H, S, S) fp32 rel-pos bias (shared by layers)

    for l in range(LAYERS):                    # static unroll, LAYERS == 2
        # ---------- self-attention sublayer (pre-norm, residual) ----------
        hn = _rms_norm(h, ln1_ref[l]).astype(jnp.bfloat16)
        qkv = jnp.dot(hn, wqkv_ref[l],
                      preferred_element_type=jnp.float32)            # fused QKV: (BS, 3D)

        q = _split_heads(qkv[:, :D_MODEL]).astype(jnp.bfloat16)       # (B*H, S, Dh)
        k = _split_heads(qkv[:, D_MODEL:2 * D_MODEL]).astype(jnp.bfloat16)
        v = _split_heads(qkv[:, 2 * D_MODEL:]).astype(jnp.bfloat16)

        # T5: no 1/sqrt(d_k) scaling; relative-position bias added to logits.
        s = jnp.einsum("bqd,bkd->bqk", q, k,
                       preferred_element_type=jnp.float32)            # (B*H, S, S) fp32
        s = s + bias
        s = s - jnp.max(s, axis=-1, keepdims=True)
        p = jnp.exp(s)
        p = p * pl.reciprocal(jnp.sum(p, axis=-1, keepdims=True), approx=True)

        ctx = jnp.einsum("bqk,bkd->bqd", p.astype(jnp.bfloat16), v,
                         preferred_element_type=jnp.float32)           # (B*H, S, Dh)
        ctx = _merge_heads(ctx).astype(jnp.bfloat16)                   # (BS, D)

        h = h + jnp.dot(ctx, wo_ref[l], preferred_element_type=jnp.float32)

        # ---------- feed-forward sublayer (pre-norm, residual, ReLU) ----------
        hn2 = _rms_norm(h, ln2_ref[l]).astype(jnp.bfloat16)
        ff = jnp.dot(hn2, wi_ref[l], preferred_element_type=jnp.float32)   # (BS, D_FF)
        ff = jnp.maximum(ff, 0.0).astype(jnp.bfloat16)                     # T5 act = ReLU
        h = h + jnp.dot(ff, wff_ref[l], preferred_element_type=jnp.float32)

    # Final encoder RMSNorm applied only to the CLS (position 0) rows — RMSNorm is
    # row-wise, so this equals norm-then-slice. Only BATCH rows are written back.
    cls = h.reshape(BATCH, SEQ, D_MODEL)[:, 0, :]                      # (B, D)
    out_ref[...] = _rms_norm(cls, lnf_ref[...]).astype(out_ref.dtype)


# ---------------- T5 relative position bias (tiny; built in plain JAX) ----------------
def _relative_position_bucket(rel_pos, num_buckets=REL_BUCKETS, max_distance=REL_MAX_DIST):
    # bidirectional (encoder) bucketing, faithful to HF T5.
    num_buckets //= 2
    buckets = (rel_pos > 0).astype(jnp.int32) * num_buckets
    rel_pos = jnp.abs(rel_pos)
    max_exact = num_buckets // 2
    is_small = rel_pos < max_exact
    rp_safe = jnp.maximum(rel_pos, 1)                       # avoid log(0); masked by where
    rel_if_large = max_exact + (
        jnp.log(rp_safe.astype(jnp.float32) / max_exact)
        / math.log(max_distance / max_exact)
        * (num_buckets - max_exact)
    ).astype(jnp.int32)
    rel_if_large = jnp.minimum(rel_if_large, num_buckets - 1)
    return buckets + jnp.where(is_small, rel_pos, rel_if_large)


def compute_position_bias(rel_emb, seq_len):
    ctx = jnp.arange(seq_len)[:, None]
    mem = jnp.arange(seq_len)[None, :]
    buckets = _relative_position_bucket(mem - ctx)          # (S, S)
    values = jnp.take(rel_emb, buckets, axis=0)             # (S, S, H)
    return jnp.transpose(values, (2, 0, 1)).astype(jnp.float32)   # (H, S, S)


# ---------------- parameter init (deterministic, synthetic) ----------------
def init_params(key):
    def nrm(k, shape, scale):
        return scale * jax.random.normal(k, shape, dtype=jnp.float32)

    ks = jax.random.split(key, 6)
    return {
        "word_emb": nrm(ks[0], (VOCAB, D_MODEL), 1.0),
        "rel_bias": nrm(ks[1], (REL_BUCKETS, HEADS), 0.1),
        # stacked per-layer weights; bf16 (MXU operands), fp32 accumulate in-kernel.
        "wqkv": nrm(ks[2], (LAYERS, D_MODEL, 3 * D_MODEL), 0.05).astype(jnp.bfloat16),
        "wo":   nrm(ks[3], (LAYERS, D_MODEL, D_MODEL), 0.05).astype(jnp.bfloat16),
        "wi":   nrm(ks[4], (LAYERS, D_MODEL, D_FF), 0.05).astype(jnp.bfloat16),
        "wff":  nrm(ks[5], (LAYERS, D_FF, D_MODEL), 0.05).astype(jnp.bfloat16),
        "ln1":  jnp.ones((LAYERS, 1, D_MODEL), jnp.float32),
        "ln2":  jnp.ones((LAYERS, 1, D_MODEL), jnp.float32),
        "lnf":  jnp.ones((1, D_MODEL), jnp.float32),
    }


# ---------------- forward: embedding lookup in JAX, encoder in one Pallas call ----------------
def t5_encoder_cls(params, input_ids):
    B, S = input_ids.shape
    # T5 does not add absolute-position / token-type embeddings and does not scale.
    h0 = jnp.take(params["word_emb"], input_ids, axis=0).reshape(B * S, D_MODEL)
    h0 = h0.astype(jnp.float32)

    pos_bias = compute_position_bias(params["rel_bias"], S)             # (H, S, S)
    # Pre-broadcast to the folded (B*H, S, S) batch layout used by the kernel (tiny).
    bias_bh = jnp.broadcast_to(pos_bias[None], (B, HEADS, S, S)).reshape(B * HEADS, S, S)

    def vmem_spec():
        return pl.BlockSpec(memory_space=pltpu.MemorySpace.VMEM)

    cls = pl.pallas_call(
        _encoder_kernel,
        out_shape=jax.ShapeDtypeStruct((B, D_MODEL), jnp.float32),       # CLS rows only
        in_specs=[vmem_spec() for _ in range(9)],
        out_specs=vmem_spec(),
    )(h0, bias_bh,
      params["wqkv"], params["wo"], params["wi"], params["wff"],
      params["ln1"], params["ln2"], params["lnf"])

    return cls                                                            # (B, D_MODEL)


if __name__ == "__main__":
    key = jax.random.PRNGKey(0)
    pkey, ikey = jax.random.split(key)

    params = init_params(pkey)
    input_ids = jax.random.randint(ikey, (BATCH, SEQ), 0, VOCAB, dtype=jnp.int32)

    cls = jax.jit(t5_encoder_cls)(params, input_ids)
    cls = jax.block_until_ready(cls)

    assert cls.shape == (BATCH, D_MODEL), cls.shape
    assert cls.dtype == jnp.float32
    assert bool(jnp.all(jnp.isfinite(cls)))
    print("KERNEL_OK")
</pallas_src>

<mosaic_0001>
module attributes {stable_mosaic.version = 11 : i64} {
  func.func @_encoder_kernel(%arg0: memref<16x32xf32, #tpu.memory_space<vmem>>, %arg1: memref<8x8x8xf32, #tpu.memory_space<vmem>>, %arg2: memref<2x32x96xbf16, #tpu.memory_space<vmem>>, %arg3: memref<2x32x32xbf16, #tpu.memory_space<vmem>>, %arg4: memref<2x32x64xbf16, #tpu.memory_space<vmem>>, %arg5: memref<2x64x32xbf16, #tpu.memory_space<vmem>>, %arg6: memref<2x1x32xf32, #tpu.memory_space<vmem>>, %arg7: memref<2x1x32xf32, #tpu.memory_space<vmem>>, %arg8: memref<1x32xf32, #tpu.memory_space<vmem>>, %arg9: memref<2x32xf32, #tpu.memory_space<vmem>>) attributes {dimension_semantics = [], scalar_prefetch = 0 : i64, scratch_operands = 0 : i64, tpu.core_type = #tpu.core_type<tc>} {
    %c0 = arith.constant 0 : index
    %c0_0 = arith.constant 0 : index
    %0 = vector.load %arg0[%c0, %c0_0] : memref<16x32xf32, #tpu.memory_space<vmem>>, vector<16x32xf32>
    %c0_1 = arith.constant 0 : index
    %c0_2 = arith.constant 0 : index
    %c0_3 = arith.constant 0 : index
    %1 = vector.load %arg1[%c0_1, %c0_2, %c0_3] : memref<8x8x8xf32, #tpu.memory_space<vmem>>, vector<8x8x8xf32>
    %c0_4 = arith.constant 0 : index
    %c0_5 = arith.constant 0 : index
    %c0_6 = arith.constant 0 : index
    %2 = vector.load %arg6[%c0_4, %c0_5, %c0_6] : memref<2x1x32xf32, #tpu.memory_space<vmem>>, vector<1x1x32xf32>
    %3 = vector.shape_cast %2 : vector<1x1x32xf32> to vector<1x32xf32>
    %4 = arith.mulf %0, %0 : vector<16x32xf32>
    %cst = arith.constant dense<0.000000e+00> : vector<16xf32>
    %5 = vector.multi_reduction <add>, %4, %cst [1] : vector<16x32xf32> to vector<16xf32>
    %6 = vector.shape_cast %5 : vector<16xf32> to vector<16x1xf32>
    %cst_7 = arith.constant 3.200000e+01 : f32
    %7 = vector.broadcast %cst_7 : f32 to vector<16x1xf32>
    %8 = arith.divf %6, %7 : vector<16x1xf32>
    %cst_8 = arith.constant 9.99999997E-7 : f32
    %9 = vector.broadcast %cst_8 : f32 to vector<16x1xf32>
    %10 = arith.addf %8, %9 : vector<16x1xf32>
    %11 = math.rsqrt %10 : vector<16x1xf32>
    %12 = vector.broadcast %11 : vector<16x1xf32> to vector<16x32xf32>
    %13 = arith.mulf %0, %12 : vector<16x32xf32>
    %14 = vector.broadcast %3 : vector<1x32xf32> to vector<16x32xf32>
    %15 = arith.mulf %13, %14 : vector<16x32xf32>
    %16 = arith.truncf %15 : vector<16x32xf32> to vector<16x32xbf16>
    %c0_9 = arith.constant 0 : index
    %c0_10 = arith.constant 0 : index
    %c0_11 = arith.constant 0 : index
    %17 = vector.load %arg2[%c0_9, %c0_10, %c0_11] : memref<2x32x96xbf16, #tpu.memory_space<vmem>>, vector<1x32x96xbf16>
    %18 = vector.shape_cast %17 : vector<1x32x96xbf16> to vector<32x96xbf16>
    %cst_12 = arith.constant dense<0.000000e+00> : vector<16x96xf32>
    %19 = tpu.matmul %16, %18, %cst_12 {dimension_numbers = #tpu.dot_dimension_numbers<[1], [0], [0], [1], [0, 0, 1, 1], [], []>} : vector<16x32xbf16>, vector<32x96xbf16>, vector<16x96xf32> -> vector<16x96xf32>
    %20 = vector.extract_strided_slice %19 {offsets = [0, 0], sizes = [16, 32], strides = [1, 1]} : vector<16x96xf32> to vector<16x32xf32>
    %21 = vector.shape_cast %20 : vector<16x32xf32> to vector<2x8x4x8xf32>
    %22 = tpu.transpose %21, [0, 2, 1, 3] : vector<2x8x4x8xf32> -> vector<2x4x8x8xf32>
    %23 = vector.shape_cast %22 : vector<2x4x8x8xf32> to vector<8x8x8xf32>
    %24 = arith.truncf %23 : vector<8x8x8xf32> to vector<8x8x8xbf16>
    %25 = vector.extract_strided_slice %19 {offsets = [0, 32], sizes = [16, 32], strides = [1, 1]} : vector<16x96xf32> to vector<16x32xf32>
    %26 = vector.shape_cast %25 : vector<16x32xf32> to vector<2x8x4x8xf32>
    %27 = tpu.transpose %26, [0, 2, 1, 3] : vector<2x8x4x8xf32> -> vector<2x4x8x8xf32>
    %28 = vector.shape_cast %27 : vector<2x4x8x8xf32> to vector<8x8x8xf32>
    %29 = arith.truncf %28 : vector<8x8x8xf32> to vector<8x8x8xbf16>
    %30 = vector.extract_strided_slice %19 {offsets = [0, 64], sizes = [16, 32], strides = [1, 1]} : vector<16x96xf32> to vector<16x32xf32>
    %31 = vector.shape_cast %30 : vector<16x32xf32> to vector<2x8x4x8xf32>
    %32 = tpu.transpose %31, [0, 2, 1, 3] : vector<2x8x4x8xf32> -> vector<2x4x8x8xf32>
    %33 = vector.shape_cast %32 : vector<2x4x8x8xf32> to vector<8x8x8xf32>
    %34 = arith.truncf %33 : vector<8x8x8xf32> to vector<8x8x8xbf16>
    "tpu.trace_start"() <{level = 10 : i32, message = "bqd,bkd->bqk"}> : () -> ()
    %cst_13 = arith.constant dense<0.000000e+00> : vector<8x8x8xf32>
    %35 = tpu.matmul %24, %29, %cst_13 {dimension_numbers = #tpu.dot_dimension_numbers<[2], [2], [1], [1], [0, 0, 0, 1, 1, 1], [0], [0]>} : vector<8x8x8xbf16>, vector<8x8x8xbf16>, vector<8x8x8xf32> -> vector<8x8x8xf32>
    "tpu.trace_stop"() : () -> ()
    %36 = arith.addf %35, %1 : vector<8x8x8xf32>
    %cst_14 = arith.constant dense<0xFF800000> : vector<8x8xf32>
    %37 = vector.multi_reduction <maximumf>, %36, %cst_14 [2] : vector<8x8x8xf32> to vector<8x8xf32>
    %38 = vector.shape_cast %37 : vector<8x8xf32> to vector<8x8x1xf32>
    %39 = vector.broadcast %38 : vector<8x8x1xf32> to vector<8x8x8xf32>
    %40 = arith.subf %36, %39 : vector<8x8x8xf32>
    %41 = math.exp %40 : vector<8x8x8xf32>
    %cst_15 = arith.constant dense<0.000000e+00> : vector<8x8xf32>
    %42 = vector.multi_reduction <add>, %41, %cst_15 [2] : vector<8x8x8xf32> to vector<8x8xf32>
    %43 = vector.shape_cast %42 : vector<8x8xf32> to vector<8x8x1xf32>
    %44 = tpu.reciprocal %43 {approx = true} : vector<8x8x1xf32> -> vector<8x8x1xf32>
    %45 = vector.broadcast %44 : vector<8x8x1xf32> to vector<8x8x8xf32>
    %46 = arith.mulf %41, %45 : vector<8x8x8xf32>
    %47 = arith.truncf %46 : vector<8x8x8xf32> to vector<8x8x8xbf16>
    "tpu.trace_start"() <{level = 10 : i32, message = "bqk,bkd->bqd"}> : () -> ()
    %cst_16 = arith.constant dense<0.000000e+00> : vector<8x8x8xf32>
    %48 = tpu.matmul %47, %34, %cst_16 {dimension_numbers = #tpu.dot_dimension_numbers<[2], [1], [1], [2], [0, 0, 0, 1, 1, 2], [0], [0]>} : vector<8x8x8xbf16>, vector<8x8x8xbf16>, vector<8x8x8xf32> -> vector<8x8x8xf32>
    "tpu.trace_stop"() : () -> ()
    %49 = vector.shape_cast %48 : vector<8x8x8xf32> to vector<2x4x8x8xf32>
    %50 = tpu.transpose %49, [0, 2, 1, 3] : vector<2x4x8x8xf32> -> vector<2x8x4x8xf32>
    %51 = vector.shape_cast %50 : vector<2x8x4x8xf32> to vector<16x32xf32>
    %52 = arith.truncf %51 : vector<16x32xf32> to vector<16x32xbf16>
    %c0_17 = arith.constant 0 : index
    %c0_18 = arith.constant 0 : index
    %c0_19 = arith.constant 0 : index
    %53 = vector.load %arg3[%c0_17, %c0_18, %c0_19] : memref<2x32x32xbf16, #tpu.memory_space<vmem>>, vector<1x32x32xbf16>
    %54 = vector.shape_cast %53 : vector<1x32x32xbf16> to vector<32x32xbf16>
    %cst_20 = arith.constant dense<0.000000e+00> : vector<16x32xf32>
    %55 = tpu.matmul %52, %54, %cst_20 {dimension_numbers = #tpu.dot_dimension_numbers<[1], [0], [0], [1], [0, 0, 1, 1], [], []>} : vector<16x32xbf16>, vector<32x32xbf16>, vector<16x32xf32> -> vector<16x32xf32>
    %56 = arith.addf %0, %55 : vector<16x32xf32>
    %c0_21 = arith.constant 0 : index
    %c0_22 = arith.constant 0 : index
    %c0_23 = arith.constant 0 : index
    %57 = vector.load %arg7[%c0_21, %c0_22, %c0_23] : memref<2x1x32xf32, #tpu.memory_space<vmem>>, vector<1x1x32xf32>
    %58 = vector.shape_cast %57 : vector<1x1x32xf32> to vector<1x32xf32>
    %59 = arith.mulf %56, %56 : vector<16x32xf32>
    %cst_24 = arith.constant dense<0.000000e+00> : vector<16xf32>
    %60 = vector.multi_reduction <add>, %59, %cst_24 [1] : vector<16x32xf32> to vector<16xf32>
    %61 = vector.shape_cast %60 : vector<16xf32> to vector<16x1xf32>
    %cst_25 = arith.constant 3.200000e+01 : f32
    %62 = vector.broadcast %cst_25 : f32 to vector<16x1xf32>
    %63 = arith.divf %61, %62 : vector<16x1xf32>
    %cst_26 = arith.constant 9.99999997E-7 : f32
    %64 = vector.broadcast %cst_26 : f32 to vector<16x1xf32>
    %65 = arith.addf %63, %64 : vector<16x1xf32>
    %66 = math.rsqrt %65 : vector<16x1xf32>
    %67 = vector.broadcast %66 : vector<16x1xf32> to vector<16x32xf32>
    %68 = arith.mulf %56, %67 : vector<16x32xf32>
    %69 = vector.broadcast %58 : vector<1x32xf32> to vector<16x32xf32>
    %70 = arith.mulf %68, %69 : vector<16x32xf32>
    %71 = arith.truncf %70 : vector<16x32xf32> to vector<16x32xbf16>
    %c0_27 = arith.constant 0 : index
    %c0_28 = arith.constant 0 : index
    %c0_29 = arith.constant 0 : index
    %72 = vector.load %arg4[%c0_27, %c0_28, %c0_29] : memref<2x32x64xbf16, #tpu.memory_space<vmem>>, vector<1x32x64xbf16>
    %73 = vector.shape_cast %72 : vector<1x32x64xbf16> to vector<32x64xbf16>
    %cst_30 = arith.constant dense<0.000000e+00> : vector<16x64xf32>
    %74 = tpu.matmul %71, %73, %cst_30 {dimension_numbers = #tpu.dot_dimension_numbers<[1], [0], [0], [1], [0, 0, 1, 1], [], []>} : vector<16x32xbf16>, vector<32x64xbf16>, vector<16x64xf32> -> vector<16x64xf32>
    %cst_31 = arith.constant 0.000000e+00 : f32
    %75 = vector.broadcast %cst_31 : f32 to vector<16x64xf32>
    %76 = arith.maximumf %74, %75 : vector<16x64xf32>
    %77 = arith.truncf %76 : vector<16x64xf32> to vector<16x64xbf16>
    %c0_32 = arith.constant 0 : index
    %c0_33 = arith.constant 0 : index
    %c0_34 = arith.constant 0 : index
    %78 = vector.load %arg5[%c0_32, %c0_33, %c0_34] : memref<2x64x32xbf16, #tpu.memory_space<vmem>>, vector<1x64x32xbf16>
    %79 = vector.shape_cast %78 : vector<1x64x32xbf16> to vector<64x32xbf16>
    %cst_35 = arith.constant dense<0.000000e+00> : vector<16x32xf32>
    %80 = tpu.matmul %77, %79, %cst_35 {dimension_numbers = #tpu.dot_dimension_numbers<[1], [0], [0], [1], [0, 0, 1, 1], [], []>} : vector<16x64xbf16>, vector<64x32xbf16>, vector<16x32xf32> -> vector<16x32xf32>
    %81 = arith.addf %56, %80 : vector<16x32xf32>
    %c1 = arith.constant 1 : index
    %c0_36 = arith.constant 0 : index
    %c0_37 = arith.constant 0 : index
    %82 = vector.load %arg6[%c1, %c0_36, %c0_37] : memref<2x1x32xf32, #tpu.memory_space<vmem>>, vector<1x1x32xf32>
    %83 = vector.shape_cast %82 : vector<1x1x32xf32> to vector<1x32xf32>
    %84 = arith.mulf %81, %81 : vector<16x32xf32>
    %cst_38 = arith.constant dense<0.000000e+00> : vector<16xf32>
    %85 = vector.multi_reduction <add>, %84, %cst_38 [1] : vector<16x32xf32> to vector<16xf32>
    %86 = vector.shape_cast %85 : vector<16xf32> to vector<16x1xf32>
    %cst_39 = arith.constant 3.200000e+01 : f32
    %87 = vector.broadcast %cst_39 : f32 to vector<16x1xf32>
    %88 = arith.divf %86, %87 : vector<16x1xf32>
    %cst_40 = arith.constant 9.99999997E-7 : f32
    %89 = vector.broadcast %cst_40 : f32 to vector<16x1xf32>
    %90 = arith.addf %88, %89 : vector<16x1xf32>
    %91 = math.rsqrt %90 : vector<16x1xf32>
    %92 = vector.broadcast %91 : vector<16x1xf32> to vector<16x32xf32>
    %93 = arith.mulf %81, %92 : vector<16x32xf32>
    %94 = vector.broadcast %83 : vector<1x32xf32> to vector<16x32xf32>
    %95 = arith.mulf %93, %94 : vector<16x32xf32>
    %96 = arith.truncf %95 : vector<16x32xf32> to vector<16x32xbf16>
    %c1_41 = arith.constant 1 : index
    %c0_42 = arith.constant 0 : index
    %c0_43 = arith.constant 0 : index
    %97 = vector.load %arg2[%c1_41, %c0_42, %c0_43] : memref<2x32x96xbf16, #tpu.memory_space<vmem>>, vector<1x32x96xbf16>
    %98 = vector.shape_cast %97 : vector<1x32x96xbf16> to vector<32x96xbf16>
    %cst_44 = arith.constant dense<0.000000e+00> : vector<16x96xf32>
    %99 = tpu.matmul %96, %98, %cst_44 {dimension_numbers = #tpu.dot_dimension_numbers<[1], [0], [0], [1], [0, 0, 1, 1], [], []>} : vector<16x32xbf16>, vector<32x96xbf16>, vector<16x96xf32> -> vector<16x96xf32>
    %100 = vector.extract_strided_slice %99 {offsets = [0, 0], sizes = [16, 32], strides = [1, 1]} : vector<16x96xf32> to vector<16x32xf32>
    %101 = vector.shape_cast %100 : vector<16x32xf32> to vector<2x8x4x8xf32>
    %102 = tpu.transpose %101, [0, 2, 1, 3] : vector<2x8x4x8xf32> -> vector<2x4x8x8xf32>
    %103 = vector.shape_cast %102 : vector<2x4x8x8xf32> to vector<8x8x8xf32>
    %104 = arith.truncf %103 : vector<8x8x8xf32> to vector<8x8x8xbf16>
    %105 = vector.extract_strided_slice %99 {offsets = [0, 32], sizes = [16, 32], strides = [1, 1]} : vector<16x96xf32> to vector<16x32xf32>
    %106 = vector.shape_cast %105 : vector<16x32xf32> to vector<2x8x4x8xf32>
    %107 = tpu.transpose %106, [0, 2, 1, 3] : vector<2x8x4x8xf32> -> vector<2x4x8x8xf32>
    %108 = vector.shape_cast %107 : vector<2x4x8x8xf32> to vector<8x8x8xf32>
    %109 = arith.truncf %108 : vector<8x8x8xf32> to vector<8x8x8xbf16>
    %110 = vector.extract_strided_slice %99 {offsets = [0, 64], sizes = [16, 32], strides = [1, 1]} : vector<16x96xf32> to vector<16x32xf32>
    %111 = vector.shape_cast %110 : vector<16x32xf32> to vector<2x8x4x8xf32>
    %112 = tpu.transpose %111, [0, 2, 1, 3] : vector<2x8x4x8xf32> -> vector<2x4x8x8xf32>
    %113 = vector.shape_cast %112 : vector<2x4x8x8xf32> to vector<8x8x8xf32>
    %114 = arith.truncf %113 : vector<8x8x8xf32> to vector<8x8x8xbf16>
    "tpu.trace_start"() <{level = 10 : i32, message = "bqd,bkd->bqk"}> : () -> ()
    %cst_45 = arith.constant dense<0.000000e+00> : vector<8x8x8xf32>
    %115 = tpu.matmul %104, %109, %cst_45 {dimension_numbers = #tpu.dot_dimension_numbers<[2], [2], [1], [1], [0, 0, 0, 1, 1, 1], [0], [0]>} : vector<8x8x8xbf16>, vector<8x8x8xbf16>, vector<8x8x8xf32> -> vector<8x8x8xf32>
    "tpu.trace_stop"() : () -> ()
    %116 = arith.addf %115, %1 : vector<8x8x8xf32>
    %cst_46 = arith.constant dense<0xFF800000> : vector<8x8xf32>
    %117 = vector.multi_reduction <maximumf>, %116, %cst_46 [2] : vector<8x8x8xf32> to vector<8x8xf32>
    %118 = vector.shape_cast %117 : vector<8x8xf32> to vector<8x8x1xf32>
    %119 = vector.broadcast %118 : vector<8x8x1xf32> to vector<8x8x8xf32>
    %120 = arith.subf %116, %119 : vector<8x8x8xf32>
    %121 = math.exp %120 : vector<8x8x8xf32>
    %cst_47 = arith.constant dense<0.000000e+00> : vector<8x8xf32>
    %122 = vector.multi_reduction <add>, %121, %cst_47 [2] : vector<8x8x8xf32> to vector<8x8xf32>
    %123 = vector.shape_cast %122 : vector<8x8xf32> to vector<8x8x1xf32>
    %124 = tpu.reciprocal %123 {approx = true} : vector<8x8x1xf32> -> vector<8x8x1xf32>
    %125 = vector.broadcast %124 : vector<8x8x1xf32> to vector<8x8x8xf32>
    %126 = arith.mulf %121, %125 : vector<8x8x8xf32>
    %127 = arith.truncf %126 : vector<8x8x8xf32> to vector<8x8x8xbf16>
    "tpu.trace_start"() <{level = 10 : i32, message = "bqk,bkd->bqd"}> : () -> ()
    %cst_48 = arith.constant dense<0.000000e+00> : vector<8x8x8xf32>
    %128 = tpu.matmul %127, %114, %cst_48 {dimension_numbers = #tpu.dot_dimension_numbers<[2], [1], [1], [2], [0, 0, 0, 1, 1, 2], [0], [0]>} : vector<8x8x8xbf16>, vector<8x8x8xbf16>, vector<8x8x8xf32> -> vector<8x8x8xf32>
    "tpu.trace_stop"() : () -> ()
    %129 = vector.shape_cast %128 : vector<8x8x8xf32> to vector<2x4x8x8xf32>
    %130 = tpu.transpose %129, [0, 2, 1, 3] : vector<2x4x8x8xf32> -> vector<2x8x4x8xf32>
    %131 = vector.shape_cast %130 : vector<2x8x4x8xf32> to vector<16x32xf32>
    %132 = arith.truncf %131 : vector<16x32xf32> to vector<16x32xbf16>
    %c1_49 = arith.constant 1 : index
    %c0_50 = arith.constant 0 : index
    %c0_51 = arith.constant 0 : index
    %133 = vector.load %arg3[%c1_49, %c0_50, %c0_51] : memref<2x32x32xbf16, #tpu.memory_space<vmem>>, vector<1x32x32xbf16>
    %134 = vector.shape_cast %133 : vector<1x32x32xbf16> to vector<32x32xbf16>
    %cst_52 = arith.constant dense<0.000000e+00> : vector<16x32xf32>
    %135 = tpu.matmul %132, %134, %cst_52 {dimension_numbers = #tpu.dot_dimension_numbers<[1], [0], [0], [1], [0, 0, 1, 1], [], []>} : vector<16x32xbf16>, vector<32x32xbf16>, vector<16x32xf32> -> vector<16x32xf32>
    %136 = arith.addf %81, %135 : vector<16x32xf32>
    %c1_53 = arith.constant 1 : index
    %c0_54 = arith.constant 0 : index
    %c0_55 = arith.constant 0 : index
    %137 = vector.load %arg7[%c1_53, %c0_54, %c0_55] : memref<2x1x32xf32, #tpu.memory_space<vmem>>, vector<1x1x32xf32>
    %138 = vector.shape_cast %137 : vector<1x1x32xf32> to vector<1x32xf32>
    %139 = arith.mulf %136, %136 : vector<16x32xf32>
    %cst_56 = arith.constant dense<0.000000e+00> : vector<16xf32>
    %140 = vector.multi_reduction <add>, %139, %cst_56 [1] : vector<16x32xf32> to vector<16xf32>
    %141 = vector.shape_cast %140 : vector<16xf32> to vector<16x1xf32>
    %cst_57 = arith.constant 3.200000e+01 : f32
    %142 = vector.broadcast %cst_57 : f32 to vector<16x1xf32>
    %143 = arith.divf %141, %142 : vector<16x1xf32>
    %cst_58 = arith.constant 9.99999997E-7 : f32
    %144 = vector.broadcast %cst_58 : f32 to vector<16x1xf32>
    %145 = arith.addf %143, %144 : vector<16x1xf32>
    %146 = math.rsqrt %145 : vector<16x1xf32>
    %147 = vector.broadcast %146 : vector<16x1xf32> to vector<16x32xf32>
    %148 = arith.mulf %136, %147 : vector<16x32xf32>
    %149 = vector.broadcast %138 : vector<1x32xf32> to vector<16x32xf32>
    %150 = arith.mulf %148, %149 : vector<16x32xf32>
    %151 = arith.truncf %150 : vector<16x32xf32> to vector<16x32xbf16>
    %c1_59 = arith.constant 1 : index
    %c0_60 = arith.constant 0 : index
    %c0_61 = arith.constant 0 : index
    %152 = vector.load %arg4[%c1_59, %c0_60, %c0_61] : memref<2x32x64xbf16, #tpu.memory_space<vmem>>, vector<1x32x64xbf16>
    %153 = vector.shape_cast %152 : vector<1x32x64xbf16> to vector<32x64xbf16>
    %cst_62 = arith.constant dense<0.000000e+00> : vector<16x64xf32>
    %154 = tpu.matmul %151, %153, %cst_62 {dimension_numbers = #tpu.dot_dimension_numbers<[1], [0], [0], [1], [0, 0, 1, 1], [], []>} : vector<16x32xbf16>, vector<32x64xbf16>, vector<16x64xf32> -> vector<16x64xf32>
    %cst_63 = arith.constant 0.000000e+00 : f32
    %155 = vector.broadcast %cst_63 : f32 to vector<16x64xf32>
    %156 = arith.maximumf %154, %155 : vector<16x64xf32>
    %157 = arith.truncf %156 : vector<16x64xf32> to vector<16x64xbf16>
    %c1_64 = arith.constant 1 : index
    %c0_65 = arith.constant 0 : index
    %c0_66 = arith.constant 0 : index
    %158 = vector.load %arg5[%c1_64, %c0_65, %c0_66] : memref<2x64x32xbf16, #tpu.memory_space<vmem>>, vector<1x64x32xbf16>
    %159 = vector.shape_cast %158 : vector<1x64x32xbf16> to vector<64x32xbf16>
    %cst_67 = arith.constant dense<0.000000e+00> : vector<16x32xf32>
    %160 = tpu.matmul %157, %159, %cst_67 {dimension_numbers = #tpu.dot_dimension_numbers<[1], [0], [0], [1], [0, 0, 1, 1], [], []>} : vector<16x64xbf16>, vector<64x32xbf16>, vector<16x32xf32> -> vector<16x32xf32>
    %161 = arith.addf %136, %160 : vector<16x32xf32>
    %162 = vector.shape_cast %161 : vector<16x32xf32> to vector<2x8x32xf32>
    %163 = vector.extract_strided_slice %162 {offsets = [0, 0, 0], sizes = [2, 1, 32], strides = [1, 1, 1]} : vector<2x8x32xf32> to vector<2x1x32xf32>
    %164 = vector.shape_cast %163 : vector<2x1x32xf32> to vector<2x32xf32>
    %c0_68 = arith.constant 0 : index
    %c0_69 = arith.constant 0 : index
    %165 = vector.load %arg8[%c0_68, %c0_69] : memref<1x32xf32, #tpu.memory_space<vmem>>, vector<1x32xf32>
    %166 = arith.mulf %164, %164 : vector<2x32xf32>
    %cst_70 = arith.constant dense<0.000000e+00> : vector<2xf32>
    %167 = vector.multi_reduction <add>, %166, %cst_70 [1] : vector<2x32xf32> to vector<2xf32>
    %168 = vector.shape_cast %167 : vector<2xf32> to vector<2x1xf32>
    %cst_71 = arith.constant 3.200000e+01 : f32
    %169 = vector.broadcast %cst_71 : f32 to vector<2x1xf32>
    %170 = arith.divf %168, %169 : vector<2x1xf32>
    %cst_72 = arith.constant 9.99999997E-7 : f32
    %171 = vector.broadcast %cst_72 : f32 to vector<2x1xf32>
    %172 = arith.addf %170, %171 : vector<2x1xf32>
    %173 = math.rsqrt %172 : vector<2x1xf32>
    %174 = vector.broadcast %173 : vector<2x1xf32> to vector<2x32xf32>
    %175 = arith.mulf %164, %174 : vector<2x32xf32>
    %176 = vector.broadcast %165 : vector<1x32xf32> to vector<2x32xf32>
    %177 = arith.mulf %175, %176 : vector<2x32xf32>
    %c0_73 = arith.constant 0 : index
    %c0_74 = arith.constant 0 : index
    %178 = vector.load %arg9[%c0_73, %c0_74] : memref<2x32xf32, #tpu.memory_space<vmem>>, vector<2x32xf32>
    tpu.vector_store %arg9[%c0_73, %c0_74], %177 {strides = array<i32>} : memref<2x32xf32, #tpu.memory_space<vmem>>, vector<2x32xf32>,
    return
  }
}

</mosaic_0001>

<bundles_post_ra>
// kernel: t5_encoder_cls.1
= control target key start
LH: loop header
LB: loop body
LE: loop exit
PB: predicated region body
PF: predicated region fallthrough
CT: control target
= control target key end

     0   :  { %vm47_vm0 = vcmask 261120   ;;  %s6555_s0 = inlined_call_operand.vmem [shape: f32[16,32], index: 0, kind: input, shape index: {}]   ;;  %s6556_s1 = inlined_call_operand.vmem [shape: f32[8,8,8], index: 1, kind: input, shape index: {}]   ;;  %s6557_s2 = inlined_call_operand.vmem [shape: bf16[2,32,96], index: 2, kind: input, shape index: {}]   ;;  %s6558_s3 = inlined_call_operand.vmem [shape: bf16[2,32,32], index: 3, kind: input, shape index: {}]   ;;  %s6559_s4 = inlined_call_operand.vmem [shape: bf16[2,32,64], index: 4, kind: input, shape index: {}]   ;;  %s6560_s5 = inlined_call_operand.vmem [shape: bf16[2,64,32], index: 5, kind: input, shape index: {}]   ;;  %s6561_s6 = inlined_call_operand.vmem [shape: f32[2,1,32], index: 6, kind: input, shape index: {}]   ;;  %s6562_s7 = inlined_call_operand.vmem [shape: f32[2,1,32], index: 7, kind: input, shape index: {}]   ;;  %s6563_s8 = inlined_call_operand.vmem [shape: f32[1,32], index: 8, kind: input, shape index: {}]   ;;  %s6564_s9 = inlined_call_operand.hbm [shape: f32[2,32], index: 9, kind: output, shape index: {}]  }
   0x1   :  { %v34_v0 = vld [vmem:[%s6555_s0] sm:$0xff]  ;;  %v35_v1 = vld [vmem:[%s6555_s0 + $0x8] sm:$0xff] }
   0x2   :  { %v45_v2 = vmul.f32 %v34_v0, %v34_v0  ;;  %v46_v3 = vmul.f32 %v35_v1, %v35_v1 }
   0x4   :  { %v48_v4 = vsel %vm47_vm0, %v45_v2, 0.0  ;;  %v51_v5 = vsel %vm47_vm0, %v46_v3, 0.0 }
   0x5   :  { %49 = vadd.xlane.f32.xlu0 %v48_v4 }
   0x9   :  { %52 = vadd.xlane.f32.xlu0 %v51_v5 }
   0xa   :  { %14 = vsyncpa [#allocation3], 0  ;;  %v5341_v6 = vld [vmem:[%s6557_s2 + $0x8] sm:$0xff]   ;;  %v5475_v7 = vmov 0.0   ;;  %vm5476_vm1 = vmmov 0   ;;  %v5342_v8 = vld [vmem:[%s6557_s2] sm:$0xff]   ;;  %v157_v29 = vlaneseq }
   0xb   :  { %5034 = vmatprep.subr.bf16.mxu1 %v5475_v7  ;;  %5038 = vmatprep.mubr.msk.bf16.mxu1 %vm5476_vm1, %v5475_v7  ;;  %v4823_v18 = vld [vmem:[%s6561_s6] ss:$0 sm:$0xff]  ;;  %s5477_s19 = smov 104   ;;  %s5478_s20 = smov 120   ;;  %v5481_v27 = vmov 1983009808  }
   0xc   :  { %5035 = vmatpush3.bf16.msra.mxu1 %v5341_v6  ;;  %5048 = vmatprep.subr.bf16.mxu0 %v5475_v7  ;;  %s5479_s21 = smov 112   ;;  %s5480_s22 = smov 96   ;;  %v155_v28 = vunpack.c.l.s4 %v5481_v27  ;;  %v5482_v30 = vmov 1934713408   ;;  %v158_v33 = vshrl.u32 %v157_v29, 7  ;;  %vm1040_vm2 = vcmask 64512  }
   0xd   :  { %5036 = vmatprep.subr.bf16.mxu1 %v5475_v7  ;;  %5050 = vmatprep.mubr.msk.bf16.mxu0 %vm5476_vm1, %v5475_v7  ;;  %v187_v31 = vunpack.c.l.s4 %v5482_v30  ;;  %s5483_s23 = smov 64   ;;  %vm1508_vm3 = vcmask 1043456   ;;  %s5484_s28 = smov 16   ;;  %vm2172_vm4 = vcmask 130048   ;;  %vm2175_vm5 = vcmask 195584  }
   0xe   :  { %v156_v32 = vunpack.c.0.s8 %v155_v28  ;;  %s5485_s29 = smov 8   ;;  %s5486_s30 = smov 24   ;;  %vm2362_vm6 = vcmask 523264   ;;  %vm4779_vm7 = vcmask 1041409   ;;  %vm4782_vm8 = vcmask 254976  }
   0xf   :  { %v188_v36 = vunpack.c.0.s8 %v187_v31  ;;  %s5487_s25 = smov [#allocation2]  }
  0x10   :  { %5037 = vmatpush3.bf16.msra.mxu1 %v5342_v8  ;;  %v5586_v37 = vsub.s32 %v156_v32, %v158_v33  ;;  %s4815_s26 = sshll.u32 %s5487_s25, 4  ;;  %s4816_s26 = int_to_ptr.vmem [resolvable:$true] %s4815_s26 }
  0x11   :  { %5042 = vmatprep.subr.bf16.mxu1 %v5475_v7  ;;  %v5591_v43 = vsub.s32 %v188_v36, %v158_v33  ;;  %s5453_s27 = scalar_lea.vmem %s4816_s26, 32  ;;  %p5458_p1 = scmp.lt.s32.totalorder %s4816_s26, %s4816_s26 }
  0x12   :  { %p5454_p0 = scmp.ne.s32.totalorder %s4816_s26, %s5453_s27  ;;  %p5459_p2 = scmp.lt.s32.totalorder %s5453_s27, %s5453_s27 }
  0x14   :  { %p5460_p3 = por %p5459_p2, %p5458_p1 }
  0x16   :  { %p5461_p4 = pnand %p5460_p3, %p5454_p0 }
  0x8e   :  { %v50_v9 = vpop.xlane.xlu0 %49 }
  0x8f   :  { %v55_v10 = vmul.f32 0.03125, %v50_v9 }
  0x91   :  { %v57_v11 = vadd.f32 1e-06, %v55_v10 }
  0x92   :  { %v53_v12 = vpop.xlane.xlu0 %52 }
  0x93   :  { %5361 = vrsqrt.f32 %v57_v11  ;;  %v56_v13 = vmul.f32 0.03125, %v53_v12 }
  0x95   :  { %v58_v14 = vadd.f32 1e-06, %v56_v13 }
  0x97   :  { %5363 = vrsqrt.f32 %v58_v14 }
  0xa0   :  { %v5362_v15 = vpop.eup %5361 }
  0xa1   :  { %v61_v16 = vmul.f32 %v5362_v15, %v34_v0 }
  0xa3   :  { %v69_v20 = vmul.f32 %v4823_v18, %v61_v16 }
  0xa4   :  { %v5364_v17 = vpop.eup %5363 }
  0xa5   :  { %v62_v19 = vmul.f32 %v5364_v17, %v35_v1 }
  0xa7   :  { %v70_v21 = vmul.f32 %v4823_v18, %v62_v19 }
  0xa9   :  { %v71_v22 = vpack.c.bf16 %v70_v21, %v69_v20 }
  0xab   :  { %5039 = vmatmul.mubr.msk.bf16.vlgmr.msra.gmra.mxu1 %vm47_vm0, %v71_v22 }
  0xac   :  { %5044 = vmatprep.mubr.msk.bf16.mxu1 %vm5476_vm1, %v5475_v7 }
 0x16b   :  { %v5566_v23 = vpop.f32.mrf.mxu1 }
 0x16c   :  { %146 = vrot.lane.b32.xlu0 %v5566_v23, %s5477_s19  ;;  %134 = vrot.lane.b32.xlu1 %v5566_v23, %s5478_s20 }
 0x16d   :  { %v5040_v24 = vpop.f32.mrf.mxu1 }
 0x16f   :  { %v5572_v25 = vpop.f32.mrf.mxu1 }
 0x170   :  { %140 = vrot.lane.b32.xlu1 %v5566_v23, %s5479_s21 }
 0x171   :  { %v5041_v26 = vpop.f32.mrf.mxu1 }
 0x174   :  { %136 = vrot.lane.b32.xlu1 %v5572_v25, %s5478_s20 }
 0x178   :  { %142 = vrot.lane.b32.xlu1 %v5572_v25, %s5479_s21 }
 0x17c   :  { %148 = vrot.lane.b32.xlu1 %v5572_v25, %s5477_s19 }
 0x180   :  { %432 = vrot.lane.b32.xlu1 %v5566_v23, %s5480_s22 }
 0x1de   :  { %v147_v34 = vpop.permute.xlu0 %146  ;;  %v135_v35 = vpop.permute.xlu1 %134 }
 0x1df   :  { %444 = vrot.lane.b32.xlu0 %v147_v34, %s5480_s22  ;;  %436 = vrot.lane.b32.xlu1 %v135_v35, %s5480_s22  ;;  %v168_v38 = vcombine.low %v135_v35, %v147_v34  ;;  %v169_v39 = vcombine.high %v135_v35, %v147_v34 }
 0x1e1   :  { %v176_v44 = vrot.slane %v168_v38, %v5586_v37  ;;  %v183_v45 = vrot.slane %v169_v39, %v5586_v37 }
 0x1e2   :  { %v141_v40 = vpop.permute.xlu1 %140 }
 0x1e3   :  { %v152_v41 = vcombine.low %v5566_v23, %v141_v40  ;;  %v153_v42 = vcombine.high %v5566_v23, %v141_v40  ;;  %440 = vrot.lane.b32.xlu1 %v141_v40, %s5480_s22 }
 0x1e5   :  { %v160_v46 = vrot.slane %v152_v41, %v5586_v37  ;;  %v167_v47 = vrot.slane %v153_v42, %v5586_v37 }
 0x1e6   :  { %v5597_v48 = vpop.permute.xlu1 %136 }
 0x1e7   :  { %v184_v49 = vcombine.low %v160_v46, %v176_v44  ;;  %v185_v50 = vcombine.high %v160_v46, %v176_v44  ;;  %v200_v51 = vcombine.low %v167_v47, %v183_v45  ;;  %v201_v52 = vcombine.high %v167_v47, %v183_v45  ;;  %434 = vrot.lane.b32.xlu1 %v5572_v25, %s5480_s22 }
 0x1e8   :  { %438 = vrot.lane.b32.xlu0 %v5597_v48, %s5480_s22 }
 0x1e9   :  { %v192_v53 = vrot.slane %v184_v49, %v5591_v43  ;;  %v199_v54 = vrot.slane %v185_v50, %v5591_v43  ;;  %v208_v55 = vrot.slane %v200_v51, %v5591_v43  ;;  %v215_v56 = vrot.slane %v201_v52, %v5591_v43 }
 0x1ea   :  { %v5607_v57 = vpop.permute.xlu1 %142 }
 0x1eb   :  { %v288_v58 = vcombine.low %v192_v53, %v199_v54  ;;  %v4827_v59 = vcombine.high %v192_v53, %v199_v54  ;;  %v304_v60 = vcombine.low %v208_v55, %v215_v56  ;;  %v4828_v61 = vcombine.high %v208_v55, %v215_v56  ;;  %442 = vrot.lane.b32.xlu1 %v5607_v57, %s5480_s22 }
 0x1ec   :  { %v220_v18 = vcombine.low %v5572_v25, %v5607_v57 }
 0x1ed   :  { %v295_v62 = vrot.slane %v288_v58, %v5586_v37  ;;  %v303_v63 = vrot.slane %v4827_v59, %v5586_v37  ;;  %v311_v0 = vrot.slane %v304_v60, %v5586_v37  ;;  %v319_v1 = vrot.slane %v4828_v61, %v5586_v37 }
 0x1ee   :  { %v5615_v2 = vpop.permute.xlu1 %148  ;;  %v228_v24 = vrot.slane %v220_v18, %v5586_v37 }
 0x1ef   :  { %740 = vrot.lane.b32.xlu1 %v135_v35, %s5483_s23  ;;  %446 = vrot.lane.b32.xlu0 %v5615_v2, %s5480_s22  ;;  %v320_v3 = vcombine.low %v295_v62, %v303_v63  ;;  %v336_v4 = vcombine.low %v311_v0, %v319_v1  ;;  %v321_v5 = vcombine.high %v295_v62, %v303_v63 }
 0x1f0   :  { %v337_v6 = vcombine.high %v311_v0, %v319_v1  ;;  %v236_v16 = vcombine.low %v5597_v48, %v5615_v2  ;;  %v237_v19 = vcombine.high %v5597_v48, %v5615_v2 }
 0x1f1   :  { %v328_v8 = vrot.slane %v320_v3, %v5591_v43  ;;  %v344_v9 = vrot.slane %v336_v4, %v5591_v43  ;;  %v335_v10 = vrot.slane %v321_v5, %v5591_v43 }
 0x1f2   :  { %v351_v11 = vrot.slane %v337_v6, %v5591_v43  ;;  %v433_v17 = vpop.permute.xlu1 %432  ;;  %v244_v20 = vrot.slane %v236_v16, %v5586_v37  ;;  %v251_v28 = vrot.slane %v237_v19, %v5586_v37 }
 0x1f3   :  { %744 = vrot.lane.b32.xlu1 %v141_v40, %s5483_s23  ;;  %736 = vrot.lane.b32.xlu0 %v5566_v23, %s5483_s23  ;;  %v5627_v12 = vcombine.low %v328_v8, %v344_v9  ;;  %v5629_v13 = vcombine.high %v328_v8, %v344_v9  ;;  %v221_v23 = vcombine.high %v5572_v25, %v5607_v57 }
 0x1f4   :  { %v5631_v14 = vcombine.low %v335_v10, %v351_v11  ;;  %v5633_v15 = vcombine.high %v335_v10, %v351_v11  ;;  %v252_v29 = vcombine.low %v228_v24, %v244_v20  ;;  %v253_v30 = vcombine.high %v228_v24, %v244_v20 }
 0x1f5   :  { %v424_v4 = vpack.c.bf16 %v5627_v12, %v5627_v12 }
 0x1f6   :  { %v260_v40 = vrot.slane %v252_v29, %v5591_v43  ;;  %v267_v41 = vrot.slane %v253_v30, %v5591_v43 }
 0x1f7   :  { %748 = vrot.lane.b32.xlu0 %v147_v34, %s5483_s23  ;;  %v235_v34 = vrot.slane %v221_v23, %v5586_v37 }
 0x1f8   :  { %v356_v58 = vcombine.low %v260_v40, %v267_v41  ;;  %v4829_v11 = vcombine.high %v260_v40, %v267_v41 }
 0x1f9   :  { %v268_v42 = vcombine.low %v235_v34, %v251_v28  ;;  %v269_v44 = vcombine.high %v235_v34, %v251_v28 }
 0x1fa   :  { %v5671_v10 = vrot.slane %v356_v58, %v5586_v37 }
 0x1fb   :  { %v5659_v55 = vrot.slane %v268_v42, %v5591_v43  ;;  %v5662_v56 = vrot.slane %v269_v44, %v5591_v43 }
 0x1fd   :  { %v372_v16 = vcombine.low %v5659_v55, %v5662_v56 }
 0x1ff   :  { %v5687_v34 = vrot.slane %v372_v16, %v5586_v37 }
 0x251   :  { %v445_v21 = vpop.permute.xlu0 %444  ;;  %v437_v22 = vpop.permute.xlu1 %436 }
 0x252   :  { %v472_v26 = vcombine.low %v437_v22, %v445_v21  ;;  %v473_v27 = vcombine.high %v437_v22, %v445_v21 }
 0x254   :  { %v480_v35 = vrot.slane %v472_v26, %v5586_v37  ;;  %v487_v36 = vrot.slane %v473_v27, %v5586_v37 }
 0x255   :  { %v441_v31 = vpop.permute.xlu1 %440 }
 0x256   :  { %v456_v32 = vcombine.low %v433_v17, %v441_v31  ;;  %v457_v33 = vcombine.high %v433_v17, %v441_v31  ;;  %v4830_v17 = vcombine.high %v5659_v55, %v5662_v56 }
 0x258   :  { %v464_v38 = vrot.slane %v456_v32, %v5586_v37  ;;  %v471_v39 = vrot.slane %v457_v33, %v5586_v37  ;;  %v5684_v33 = vrot.slane %v4829_v11, %v5586_v37 }
 0x259   :  { %v435_v45 = vpop.permute.xlu1 %434 }
 0x25a   :  { %v488_v46 = vcombine.low %v464_v38, %v480_v35  ;;  %v489_v47 = vcombine.high %v464_v38, %v480_v35  ;;  %v504_v49 = vcombine.low %v471_v39, %v487_v36  ;;  %v505_v50 = vcombine.high %v471_v39, %v487_v36  ;;  %v439_v59 = vpop.permute.xlu0 %438 }
 0x25c   :  { %v496_v51 = vrot.slane %v488_v46, %v5591_v43  ;;  %v503_v52 = vrot.slane %v489_v47, %v5591_v43  ;;  %v512_v53 = vrot.slane %v504_v49, %v5591_v43  ;;  %v519_v54 = vrot.slane %v505_v50, %v5591_v43 }
 0x25d   :  { %v443_v60 = vpop.permute.xlu1 %442 }
 0x25e   :  { %v592_v61 = vcombine.low %v496_v51, %v503_v52  ;;  %v4831_v62 = vcombine.high %v496_v51, %v503_v52  ;;  %v608_v63 = vcombine.low %v512_v53, %v519_v54  ;;  %v4832_v0 = vcombine.high %v512_v53, %v519_v54 }
 0x25f   :  { %v524_v1 = vcombine.low %v435_v45, %v443_v60  ;;  %v525_v3 = vcombine.high %v435_v45, %v443_v60 }
 0x260   :  { %v599_v5 = vrot.slane %v592_v61, %v5586_v37  ;;  %v607_v6 = vrot.slane %v4831_v62, %v5586_v37  ;;  %v615_v8 = vrot.slane %v608_v63, %v5586_v37  ;;  %v623_v9 = vrot.slane %v4832_v0, %v5586_v37 }
 0x261   :  { %v447_v18 = vpop.permute.xlu0 %446  ;;  %v741_v19 = vpop.permute.xlu1 %740  ;;  %v532_v24 = vrot.slane %v524_v1, %v5586_v37  ;;  %v539_v26 = vrot.slane %v525_v3, %v5586_v37 }
 0x262   :  { %v540_v20 = vcombine.low %v439_v59, %v447_v18  ;;  %v541_v21 = vcombine.high %v439_v59, %v447_v18  ;;  %v624_v22 = vcombine.low %v599_v5, %v607_v6  ;;  %v640_v23 = vcombine.low %v615_v8, %v623_v9 }
 0x263   :  { %v625_v27 = vcombine.high %v599_v5, %v607_v6  ;;  %v641_v28 = vcombine.high %v615_v8, %v623_v9 }
 0x264   :  { %v548_v29 = vrot.slane %v540_v20, %v5586_v37  ;;  %v555_v30 = vrot.slane %v541_v21, %v5586_v37  ;;  %v632_v31 = vrot.slane %v624_v22, %v5591_v43  ;;  %v648_v32 = vrot.slane %v640_v23, %v5591_v43 }
 0x265   :  { %v745_v35 = vpop.permute.xlu1 %744  ;;  %v639_v36 = vrot.slane %v625_v27, %v5591_v43  ;;  %v655_v38 = vrot.slane %v641_v28, %v5591_v43  ;;  %v737_v44 = vpop.permute.xlu0 %736  ;;  %v5707_v20 = vrot.slane %v4830_v17, %v5586_v37 }
 0x266   :  { %v556_v39 = vcombine.low %v532_v24, %v548_v29  ;;  %v557_v40 = vcombine.high %v532_v24, %v548_v29  ;;  %v572_v41 = vcombine.low %v539_v26, %v555_v30  ;;  %v573_v42 = vcombine.high %v539_v26, %v555_v30 }
 0x267   :  { %v760_v45 = vcombine.low %v737_v44, %v745_v35  ;;  %v761_v46 = vcombine.high %v737_v44, %v745_v35  ;;  %v656_v47 = vcombine.low %v632_v31, %v648_v32  ;;  %v657_v49 = vcombine.high %v632_v31, %v648_v32 }
 0x268   :  { %v564_v50 = vrot.slane %v556_v39, %v5591_v43  ;;  %v571_v51 = vrot.slane %v557_v40, %v5591_v43  ;;  %v580_v52 = vrot.slane %v572_v41, %v5591_v43  ;;  %v587_v53 = vrot.slane %v573_v42, %v5591_v43 }
 0x269   :  { %v768_v54 = vrot.slane %v760_v45, %v5586_v37  ;;  %v775_v55 = vrot.slane %v761_v46, %v5586_v37  ;;  %v728_v56 = vpack.c.bf16 %v656_v47, %v656_v47  ;;  %v729_v58 = vpack.c.bf16 %v657_v49, %v657_v49  ;;  %v749_v63 = vpop.permute.xlu0 %748 }
 0x26a   :  { %v660_v59 = vcombine.low %v564_v50, %v571_v51  ;;  %v4833_v60 = vcombine.high %v564_v50, %v571_v51  ;;  %v676_v61 = vcombine.low %v580_v52, %v587_v53  ;;  %v4834_v62 = vcombine.high %v580_v52, %v587_v53 }
 0x26b   :  { %v776_v0 = vcombine.low %v741_v19, %v749_v63  ;;  %v777_v1 = vcombine.high %v741_v19, %v749_v63  ;;  %v1045_v3 = vsel %vm1040_vm2, %v728_v56, 0  ;;  %v1091_v5 = vsel %vm1040_vm2, %v729_v58, 0 }
 0x26c   :  { %v667_v6 = vrot.slane %v660_v59, %v5586_v37  ;;  %v675_v8 = vrot.slane %v4833_v60, %v5586_v37  ;;  %v683_v9 = vrot.slane %v676_v61, %v5586_v37  ;;  %v691_v11 = vrot.slane %v4834_v62, %v5586_v37  ;;  %5043 = vmatpush3.bf16.xpose.msra.mxu1 %v1045_v3 }
 0x26d   :  { %v784_v16 = vrot.slane %v776_v0, %v5586_v37  ;;  %v791_v18 = vrot.slane %v777_v1, %v5586_v37  ;;  %5049 = vmatpush3.bf16.xpose.msra.mxu0 %v1091_v5  ;;  %5054 = vmatprep.subr.bf16.mxu1 %v5475_v7  ;;  %v658_v19 = vcombine.low %v639_v36, %v655_v38 }
 0x26e   :  { %5060 = vmatprep.subr.bf16.mxu0 %v5475_v7  ;;  %v659_v21 = vcombine.high %v639_v36, %v655_v38  ;;  %v692_v22 = vcombine.low %v667_v6, %v675_v8  ;;  %v708_v23 = vcombine.low %v683_v9, %v691_v11  ;;  %v425_v38 = vpack.c.bf16 %v5629_v13, %v5629_v13 }
 0x26f   :  { %v792_v24 = vcombine.low %v768_v54, %v784_v16  ;;  %v793_v26 = vcombine.high %v768_v54, %v784_v16  ;;  %v808_v27 = vcombine.low %v775_v55, %v791_v18  ;;  %v809_v28 = vcombine.high %v775_v55, %v791_v18 }
 0x270   :  { %v730_v29 = vpack.c.bf16 %v658_v19, %v658_v19  ;;  %v731_v30 = vpack.c.bf16 %v659_v21, %v659_v21  ;;  %v700_v31 = vrot.slane %v692_v22, %v5591_v43  ;;  %v716_v32 = vrot.slane %v708_v23, %v5591_v43 }
 0x271   :  { %v800_v35 = vrot.slane %v792_v24, %v5591_v43  ;;  %v807_v17 = vrot.slane %v793_v26, %v5591_v43  ;;  %v816_v39 = vrot.slane %v808_v27, %v5591_v43  ;;  %v823_v36 = vrot.slane %v809_v28, %v5591_v43 }
 0x272   :  { %v1137_v40 = vsel %vm1040_vm2, %v730_v29, 0  ;;  %v724_v41 = vcombine.low %v700_v31, %v716_v32  ;;  %v693_v42 = vcombine.high %v667_v6, %v675_v8  ;;  %v1183_v49 = vsel %vm1040_vm2, %v731_v30, 0 }
 0x273   :  { %v896_v44 = vcombine.low %v800_v35, %v807_v17  ;;  %v4835_v45 = vcombine.high %v800_v35, %v807_v17  ;;  %v912_v46 = vcombine.low %v816_v39, %v823_v36  ;;  %v4836_v47 = vcombine.high %v816_v39, %v823_v36  ;;  %5045 = vmatmul.mubr.msk.bf16.vlgmr.msra.gmra.mxu1 %vm1040_vm2, %v424_v4 }
 0x274   :  { %5051 = vmatmul.mubr.msk.bf16.vlgmr.msra.gmra.mxu0 %vm1040_vm2, %v425_v38  ;;  %5055 = vmatpush3.bf16.xpose.msra.mxu1 %v1137_v40  ;;  %v725_v50 = vcombine.high %v700_v31, %v716_v32  ;;  %v388_v13 = vcombine.low %v5671_v10, %v5684_v33  ;;  %v404_v51 = vcombine.low %v5687_v34, %v5707_v20 }
 0x275   :  { %v903_v52 = vrot.slane %v896_v44, %v5586_v37  ;;  %v911_v53 = vrot.slane %v4835_v45, %v5586_v37  ;;  %v919_v12 = vrot.slane %v912_v46, %v5586_v37  ;;  %v927_v4 = vrot.slane %v4836_v47, %v5586_v37  ;;  %5061 = vmatpush3.bf16.xpose.msra.mxu0 %v1183_v49  ;;  %v36_v44 = vld [vmem:[%s6556_s1] sm:$0xff]  ;;  %v37_v45 = vld [vmem:[%s6556_s1 + $0x8] sm:$0xff] }
 0x276   :  { %5056 = vmatprep.mubr.msk.bf16.mxu1 %vm5476_vm1, %v5475_v7  ;;  %5062 = vmatprep.mubr.msk.bf16.mxu0 %vm5476_vm1, %v5475_v7  ;;  %v709_v54 = vcombine.high %v683_v9, %v691_v11  ;;  %v732_v55 = vpack.c.bf16 %v724_v41, %v724_v41  ;;  %v707_v56 = vrot.slane %v693_v42, %v5591_v43 }
 0x277   :  { %5066 = vmatprep.subr.bf16.mxu1 %v5475_v7  ;;  %5072 = vmatprep.subr.bf16.mxu0 %v5475_v7  ;;  %v929_v58 = vcombine.high %v903_v52, %v911_v53  ;;  %v733_v59 = vpack.c.bf16 %v725_v50, %v725_v50  ;;  %v945_v61 = vcombine.high %v919_v12, %v927_v4 }
 0x278   :  { %v723_v60 = vrot.slane %v709_v54, %v5591_v43  ;;  %v426_v62 = vpack.c.bf16 %v5631_v14, %v5631_v14  ;;  %v396_v63 = vrot.slane %v388_v13, %v5591_v43  ;;  %v412_v0 = vrot.slane %v404_v51, %v5591_v43 }
 0x279   :  { %v943_v1 = vrot.slane %v929_v58, %v5591_v43  ;;  %v427_v3 = vpack.c.bf16 %v5633_v15, %v5633_v15  ;;  %v959_v5 = vrot.slane %v945_v61, %v5591_v43  ;;  %v1229_v6 = vsel %vm1040_vm2, %v732_v55, 0  ;;  %v38_v55 = vld [vmem:[%s6556_s1 + $0x10] sm:$0xff]  ;;  %v39_v58 = vld [vmem:[%s6556_s1 + $0x18] sm:$0xff] }
 0x27a   :  { %v726_v8 = vcombine.low %v707_v56, %v723_v60  ;;  %v928_v9 = vcombine.low %v903_v52, %v911_v53  ;;  %v944_v11 = vcombine.low %v919_v12, %v927_v4  ;;  %v1275_v14 = vsel %vm1040_vm2, %v733_v59, 0 }
 0x27b   :  { %5057 = vmatmul.mubr.msk.bf16.vlgmr.msra.gmra.mxu1 %vm1040_vm2, %v426_v62  ;;  %v727_v16 = vcombine.high %v707_v56, %v723_v60  ;;  %v389_v18 = vcombine.high %v5671_v10, %v5684_v33  ;;  %v5755_v19 = vcombine.low %v943_v1, %v959_v5  ;;  %v420_v15 = vcombine.low %v396_v63, %v412_v0 }
 0x27c   :  { %5063 = vmatmul.mubr.msk.bf16.vlgmr.msra.gmra.mxu0 %vm1040_vm2, %v427_v3  ;;  %5067 = vmatpush3.bf16.xpose.msra.mxu1 %v1229_v6  ;;  %v405_v21 = vcombine.high %v5687_v34, %v5707_v20  ;;  %v5761_v22 = vcombine.high %v943_v1, %v959_v5  ;;  %v421_v23 = vcombine.high %v396_v63, %v412_v0 }
 0x27d   :  { %5073 = vmatpush3.bf16.xpose.msra.mxu0 %v1275_v14  ;;  %5068 = vmatprep.mubr.msk.bf16.mxu1 %vm5476_vm1, %v5475_v7  ;;  %v734_v10 = vpack.c.bf16 %v726_v8, %v726_v8  ;;  %v936_v33 = vrot.slane %v928_v9, %v5591_v43  ;;  %v952_v24 = vrot.slane %v944_v11, %v5591_v43  ;;  %v40_v9 = vld [vmem:[%s6556_s1 + $0x20] sm:$0xff]  ;;  %v41_v14 = vld [vmem:[%s6556_s1 + $0x28] sm:$0xff] }
 0x27e   :  { %5074 = vmatprep.mubr.msk.bf16.mxu0 %vm5476_vm1, %v5475_v7  ;;  %5078 = vmatprep.subr.bf16.mxu1 %v5475_v7  ;;  %v735_v26 = vpack.c.bf16 %v727_v16, %v727_v16  ;;  %v428_v27 = vpack.c.bf16 %v420_v15, %v420_v15  ;;  %v403_v28 = vrot.slane %v389_v18, %v5591_v43 }
 0x27f   :  { %5084 = vmatprep.subr.bf16.mxu0 %v5475_v7  ;;  %v419_v34 = vrot.slane %v405_v21, %v5591_v43  ;;  %v429_v20 = vpack.c.bf16 %v421_v23, %v421_v23  ;;  %v1321_v29 = vsel %vm1040_vm2, %v734_v10, 0  ;;  %v960_v30 = vcombine.low %v936_v33, %v952_v24 }
 0x280   :  { %v1367_v31 = vsel %vm1040_vm2, %v735_v26, 0  ;;  %v961_v32 = vcombine.high %v936_v33, %v952_v24 }
 0x281   :  { %v422_v35 = vcombine.low %v403_v28, %v419_v34  ;;  %v423_v17 = vcombine.high %v403_v28, %v419_v34  ;;  %v1032_v39 = vpack.c.bf16 %v960_v30, %v960_v30  ;;  %v42_v34 = vld [vmem:[%s6556_s1 + $0x30] sm:$0xff] }
 0x282   :  { %v1033_v36 = vpack.c.bf16 %v961_v32, %v961_v32 }
 0x283   :  { %5069 = vmatmul.mubr.msk.bf16.vlgmr.msra.gmra.mxu1 %vm1040_vm2, %v428_v27  ;;  %v430_v38 = vpack.c.bf16 %v422_v35, %v422_v35  ;;  %v431_v40 = vpack.c.bf16 %v423_v17, %v423_v17  ;;  %v1510_v41 = vsel %vm1508_vm3, %v1032_v39, 0 }
 0x284   :  { %5075 = vmatmul.mubr.msk.bf16.vlgmr.msra.gmra.mxu0 %vm1040_vm2, %v429_v20  ;;  %5079 = vmatpush3.bf16.xpose.msra.mxu1 %v1321_v29  ;;  %v1556_v42 = vsel %vm1508_vm3, %v1033_v36, 0  ;;  %v43_v29 = vld [vmem:[%s6556_s1 + $0x38] sm:$0xff] }
 0x285   :  { %5085 = vmatpush3.bf16.xpose.msra.mxu0 %v1367_v31  ;;  %5080 = vmatprep.mubr.msk.bf16.mxu1 %vm5476_vm1, %v5475_v7 }
 0x286   :  { %5086 = vmatprep.mubr.msk.bf16.mxu0 %vm5476_vm1, %v5475_v7  ;;  %5090 = vmatprep.subr.bf16.mxu1 %v5475_v7 }
 0x287   :  { %5096 = vmatprep.subr.bf16.mxu0 %v5475_v7 }
 0x28b   :  { %5081 = vmatmul.mubr.msk.bf16.vlgmr.msra.gmra.mxu1 %vm1040_vm2, %v430_v38 }
 0x28c   :  { %5087 = vmatmul.mubr.msk.bf16.vlgmr.msra.gmra.mxu0 %vm1040_vm2, %v431_v40  ;;  %5091 = vmatpush3.bf16.msra.mxu1 %v1510_v41 }
 0x28d   :  { %5097 = vmatpush3.bf16.msra.mxu0 %v1556_v42  ;;  %5092 = vmatprep.mubr.msk.bf16.mxu1 %vm5476_vm1, %v5475_v7 }
 0x28e   :  { %5098 = vmatprep.mubr.msk.bf16.mxu0 %vm5476_vm1, %v5475_v7  ;;  %5102 = vmatprep.subr.bf16.mxu1 %v5475_v7 }
 0x28f   :  { %5108 = vmatprep.subr.bf16.mxu0 %v5475_v7 }
 0x333   :  { %v1081_v46 = vpop.f32.mrf.mxu1 }
 0x334   :  { %v5797_v47 = vadd.f32 %v1081_v46, %v36_v44  ;;  %v1127_v49 = vpop.f32.mrf.mxu0 }
 0x335   :  { %v5799_v50 = vadd.f32 %v1127_v49, %v37_v45  ;;  %v5046_v13 = vpop.f32.mrf.mxu1 }
 0x336   :  { %v5052_v51 = vpop.f32.mrf.mxu0  ;;  %v1409_v52 = vsel %vm1040_vm2, %v5797_v47, -inf }
 0x337   :  { %v1412_v53 = vsel %vm1040_vm2, %v5799_v50, -inf  ;;  %1410 = vmax.xlane.f32.xlu1 %v1409_v52  ;;  %v1084_v12 = vpop.f32.mrf.mxu1 }
 0x338   :  { %1413 = vmax.xlane.f32.xlu0 %v1412_v53  ;;  %v1130_v4 = vpop.f32.mrf.mxu0 }
 0x339   :  { %v5047_v54 = vpop.f32.mrf.mxu1 }
 0x33a   :  { %v5053_v56 = vpop.f32.mrf.mxu0 }
 0x33b   :  { %v1173_v59 = vpop.f32.mrf.mxu1 }
 0x33c   :  { %v1174_v60 = vadd.f32 %v1173_v59, %v38_v55  ;;  %v1219_v61 = vpop.f32.mrf.mxu0 }
 0x33d   :  { %v1220_v62 = vadd.f32 %v1219_v61, %v39_v58  ;;  %v5058_v63 = vpop.f32.mrf.mxu1 }
 0x33e   :  { %v5064_v0 = vpop.f32.mrf.mxu0  ;;  %v1415_v1 = vsel %vm1040_vm2, %v1174_v60, -inf }
 0x33f   :  { %v1418_v3 = vsel %vm1040_vm2, %v1220_v62, -inf  ;;  %1416 = vmax.xlane.f32.xlu0 %v1415_v1  ;;  %v1176_v5 = vpop.f32.mrf.mxu1 }
 0x340   :  { %v1222_v6 = vpop.f32.mrf.mxu0  ;;  %1419 = vmax.xlane.f32.xlu1 %v1418_v3 }
 0x341   :  { %v5059_v8 = vpop.f32.mrf.mxu1 }
 0x342   :  { %v5065_v11 = vpop.f32.mrf.mxu0 }
 0x343   :  { %v1265_v16 = vpop.f32.mrf.mxu1 }
 0x344   :  { %v1266_v18 = vadd.f32 %v1265_v16, %v40_v9  ;;  %v1311_v15 = vpop.f32.mrf.mxu0 }
 0x345   :  { %v1312_v21 = vadd.f32 %v1311_v15, %v41_v14  ;;  %v5070_v23 = vpop.f32.mrf.mxu1 }
 0x346   :  { %v5076_v10 = vpop.f32.mrf.mxu0  ;;  %v1421_v33 = vsel %vm1040_vm2, %v1266_v18, -inf }
 0x347   :  { %v1424_v24 = vsel %vm1040_vm2, %v1312_v21, -inf  ;;  %1422 = vmax.xlane.f32.xlu0 %v1421_v33  ;;  %v1268_v26 = vpop.f32.mrf.mxu1 }
 0x348   :  { %v1314_v27 = vpop.f32.mrf.mxu0  ;;  %1425 = vmax.xlane.f32.xlu1 %v1424_v24 }
 0x349   :  { %v5071_v28 = vpop.f32.mrf.mxu1 }
 0x34a   :  { %v5077_v20 = vpop.f32.mrf.mxu0 }
 0x34b   :  { %v1357_v30 = vpop.f32.mrf.mxu1 }
 0x34c   :  { %v5827_v31 = vadd.f32 %v1357_v30, %v42_v34  ;;  %v1403_v32 = vpop.f32.mrf.mxu0 }
 0x34d   :  { %v1404_v35 = vadd.f32 %v1403_v32, %v43_v29  ;;  %v5082_v17 = vpop.f32.mrf.mxu1  ;;  %v1034_v32 = vpack.c.bf16 %v5755_v19, %v5755_v19 }
 0x34e   :  { %v5088_v39 = vpop.f32.mrf.mxu0  ;;  %v1427_v36 = vsel %vm1040_vm2, %v5827_v31, -inf }
 0x34f   :  { %v1430_v38 = vsel %vm1040_vm2, %v1404_v35, -inf  ;;  %1428 = vmax.xlane.f32.xlu0 %v1427_v36  ;;  %v1360_v40 = vpop.f32.mrf.mxu1  ;;  %v1035_v39 = vpack.c.bf16 %v5761_v22, %v5761_v22 }
 0x350   :  { %v1406_v41 = vpop.f32.mrf.mxu0  ;;  %1431 = vmax.xlane.f32.xlu1 %v1430_v38 }
 0x351   :  { %v5083_v42 = vpop.f32.mrf.mxu1  ;;  %v1602_v41 = vsel %vm1508_vm3, %v1034_v32, 0 }
 0x352   :  { %v5089_v44 = vpop.f32.mrf.mxu0  ;;  %v1648_v42 = vsel %vm1508_vm3, %v1035_v39, 0 }
 0x361   :  { %742 = vrot.lane.b32.xlu1 %v5597_v48, %s5483_s23 }
 0x365   :  { %738 = vrot.lane.b32.xlu0 %v5572_v25, %s5483_s23 }
 0x3c0   :  { %v1411_v45 = vpop.xlane.xlu1 %1410 }
 0x3c1   :  { %v1414_v46 = vpop.xlane.xlu0 %1413  ;;  %v1433_v49 = vsub.f32 %v5797_v47, %v1411_v45 }
 0x3c2   :  { %v1434_v13 = vsub.f32 %v5799_v50, %v1414_v46 }
 0x3c3   :  { %v1441_v51 = vmul.f32 1.442695, %v1433_v49 }
 0x3c4   :  { %v1443_v52 = vmul.f32 1.442695, %v1434_v13 }
 0x3c5   :  { %5365 = vpow2.f32 %v1441_v51 }
 0x3c6   :  { %5367 = vpow2.f32 %v1443_v52 }
 0x3c8   :  { %v1417_v53 = vpop.xlane.xlu0 %1416 }
 0x3c9   :  { %v1420_v12 = vpop.xlane.xlu1 %1419  ;;  %v1435_v4 = vsub.f32 %v1174_v60, %v1417_v53 }
 0x3ca   :  { %v1436_v54 = vsub.f32 %v1220_v62, %v1420_v12 }
 0x3cb   :  { %v1445_v55 = vmul.f32 1.442695, %v1435_v4 }
 0x3cc   :  { %v1447_v56 = vmul.f32 1.442695, %v1436_v54 }
 0x3cd   :  { %5369 = vpow2.f32 %v1445_v55 }
 0x3ce   :  { %5371 = vpow2.f32 %v1447_v56 }
 0x3d0   :  { %v1423_v48 = vpop.xlane.xlu0 %1422 }
 0x3d1   :  { %v1426_v25 = vpop.xlane.xlu1 %1425  ;;  %v1437_v58 = vsub.f32 %v1266_v18, %v1423_v48 }
 0x3d2   :  { %v5366_v59 = vpop.eup %5365  ;;  %v1438_v61 = vsub.f32 %v1312_v21, %v1426_v25 }
 0x3d3   :  { %v5368_v47 = vpop.eup %5367  ;;  %v1449_v63 = vmul.f32 1.442695, %v1437_v58  ;;  %v1457_v50 = vsel %vm1040_vm2, %v5366_v59, 0.0 }
 0x3d4   :  { %v1451_v0 = vmul.f32 1.442695, %v1438_v61  ;;  %v1460_v1 = vsel %vm1040_vm2, %v5368_v47, 0.0  ;;  %1458 = vadd.xlane.f32.xlu0 %v1457_v50 }
 0x3d5   :  { %5373 = vpow2.f32 %v1449_v63  ;;  %1461 = vadd.xlane.f32.xlu1 %v1460_v1 }
 0x3d6   :  { %5375 = vpow2.f32 %v1451_v0 }
 0x3d8   :  { %v1429_v16 = vpop.xlane.xlu0 %1428 }
 0x3d9   :  { %v1432_v14 = vpop.xlane.xlu1 %1431  ;;  %v1439_v15 = vsub.f32 %v5827_v31, %v1429_v16 }
 0x3da   :  { %v5840_v60 = vpop.eup %5369  ;;  %v1440_v18 = vsub.f32 %v1404_v35, %v1432_v14 }
 0x3db   :  { %v5842_v62 = vpop.eup %5371  ;;  %v1463_v3 = vsel %vm1040_vm2, %v5840_v60, 0.0  ;;  %v1453_v23 = vmul.f32 1.442695, %v1439_v15 }
 0x3dc   :  { %1464 = vadd.xlane.f32.xlu1 %v1463_v3  ;;  %v1466_v5 = vsel %vm1040_vm2, %v5842_v62, 0.0  ;;  %v1455_v21 = vmul.f32 1.442695, %v1440_v18 }
 0x3dd   :  { %1467 = vadd.xlane.f32.xlu0 %v1466_v5  ;;  %v743_v26 = vpop.permute.xlu1 %742 }
 0x3de   :  { %5377 = vpow2.f32 %v1455_v21 }
 0x3df   :  { %5379 = vpow2.f32 %v1453_v23 }
 0x3e2   :  { %v5848_v6 = vpop.eup %5373 }
 0x3e3   :  { %v5850_v8 = vpop.eup %5375  ;;  %v1469_v9 = vsel %vm1040_vm2, %v5848_v6, 0.0 }
 0x3e4   :  { %v1472_v11 = vsel %vm1040_vm2, %v5850_v8, 0.0  ;;  %1470 = vadd.xlane.f32.xlu0 %v1469_v9 }
 0x3e5   :  { %1473 = vadd.xlane.f32.xlu1 %v1472_v11 }
 0x3eb   :  { %v5861_v10 = vpop.eup %5377 }
 0x3ec   :  { %v5863_v33 = vpop.eup %5379  ;;  %v1478_v24 = vsel %vm1040_vm2, %v5861_v10, 0.0 }
 0x3f6   :  { %746 = vrot.lane.b32.xlu1 %v5607_v57, %s5483_s23  ;;  %v1475_v57 = vsel %vm1040_vm2, %v5863_v33, 0.0 }
 0x3fa   :  { %750 = vrot.lane.b32.xlu0 %v5615_v2, %s5483_s23  ;;  %v739_v2 = vpop.permute.xlu0 %738 }
 0x419   :  { %1479 = vadd.xlane.f32.xlu0 %v1478_v24 }
 0x41a   :  { %1476 = vadd.xlane.f32.xlu1 %v1475_v57 }
 0x45d   :  { %v1459_v27 = vpop.xlane.xlu0 %1458 }
 0x45e   :  { %v1462_v28 = vpop.xlane.xlu1 %1461  ;;  %5381 = vrcp.f32 %v1459_v27 }
 0x45f   :  { %5383 = vrcp.f32 %v1462_v28 }
 0x465   :  { %v1465_v34 = vpop.xlane.xlu1 %1464 }
 0x466   :  { %5385 = vrcp.f32 %v1465_v34  ;;  %v1468_v20 = vpop.xlane.xlu0 %1467 }
 0x467   :  { %5387 = vrcp.f32 %v1468_v20 }
 0x46b   :  { %v5382_v29 = vpop.eup %5381 }
 0x46c   :  { %v5384_v30 = vpop.eup %5383  ;;  %v1489_v31 = vmul.f32 %v5382_v29, %v5366_v59 }
 0x46d   :  { %v1471_v35 = vpop.xlane.xlu0 %1470  ;;  %v1490_v17 = vmul.f32 %v5384_v30, %v5368_v47 }
 0x46e   :  { %v1474_v36 = vpop.xlane.xlu1 %1473  ;;  %v1497_v38 = vpack.c.bf16 %v1489_v31, %v1489_v31  ;;  %5389 = vrcp.f32 %v1471_v35 }
 0x46f   :  { %v1498_v40 = vpack.c.bf16 %v1490_v17, %v1490_v17  ;;  %5391 = vrcp.f32 %v1474_v36 }
 0x470   :  { %5093 = vmatmul.mubr.msk.bf16.vlgmr.msra.gmra.mxu1 %vm1040_vm2, %v1497_v38 }
 0x471   :  { %5099 = vmatmul.mubr.msk.bf16.vlgmr.msra.gmra.mxu0 %vm1040_vm2, %v1498_v40  ;;  %5103 = vmatpush3.bf16.msra.mxu1 %v1602_v41  ;;  %v751_v44 = vpop.permute.xlu0 %750 }
 0x472   :  { %5109 = vmatpush3.bf16.msra.mxu0 %v1648_v42  ;;  %v747_v19 = vpop.permute.xlu1 %746  ;;  %v844_v45 = vcombine.low %v743_v26, %v751_v44  ;;  %v845_v46 = vcombine.high %v743_v26, %v751_v44  ;;  %5104 = vmatprep.mubr.msk.bf16.mxu1 %vm5476_vm1, %v5475_v7 }
 0x473   :  { %v5386_v22 = vpop.eup %5385  ;;  %v828_v49 = vcombine.low %v739_v2, %v747_v19  ;;  %v829_v13 = vcombine.high %v739_v2, %v747_v19  ;;  %5110 = vmatprep.mubr.msk.bf16.mxu0 %vm5476_vm1, %v5475_v7  ;;  %5114 = vmatprep.subr.bf16.mxu1 %v5475_v7 }
 0x474   :  { %v5388_v51 = vpop.eup %5387  ;;  %v852_v52 = vrot.slane %v844_v45, %v5586_v37  ;;  %v859_v53 = vrot.slane %v845_v46, %v5586_v37  ;;  %v1491_v12 = vmul.f32 %v5386_v22, %v5840_v60  ;;  %5120 = vmatprep.subr.bf16.mxu0 %v5475_v7 }
 0x475   :  { %v836_v4 = vrot.slane %v828_v49, %v5586_v37  ;;  %v843_v54 = vrot.slane %v829_v13, %v5586_v37  ;;  %v1492_v55 = vmul.f32 %v5388_v51, %v5842_v62 }
 0x476   :  { %v1499_v56 = vpack.c.bf16 %v1491_v12, %v1491_v12 }
 0x477   :  { %v860_v48 = vcombine.low %v836_v4, %v852_v52  ;;  %v861_v25 = vcombine.high %v836_v4, %v852_v52  ;;  %v876_v58 = vcombine.low %v843_v54, %v859_v53  ;;  %v877_v59 = vcombine.high %v843_v54, %v859_v53 }
 0x478   :  { %5105 = vmatmul.mubr.msk.bf16.vlgmr.msra.gmra.mxu1 %vm1040_vm2, %v1499_v56  ;;  %v1500_v61 = vpack.c.bf16 %v1492_v55, %v1492_v55 }
 0x479   :  { %v868_v47 = vrot.slane %v860_v48, %v5591_v43  ;;  %v875_v63 = vrot.slane %v861_v25, %v5591_v43  ;;  %v884_v50 = vrot.slane %v876_v58, %v5591_v43  ;;  %v891_v0 = vrot.slane %v877_v59, %v5591_v43  ;;  %5116 = vmatprep.mubr.msk.bf16.mxu1 %vm5476_vm1, %v5475_v7 }
 0x47a   :  { %5111 = vmatmul.mubr.msk.bf16.vlgmr.msra.gmra.mxu0 %vm1040_vm2, %v1500_v61 }
 0x47b   :  { %v964_v1 = vcombine.low %v868_v47, %v875_v63  ;;  %v4837_v60 = vcombine.high %v868_v47, %v875_v63  ;;  %v980_v62 = vcombine.low %v884_v50, %v891_v0  ;;  %v4838_v3 = vcombine.high %v884_v50, %v891_v0  ;;  %5122 = vmatprep.mubr.msk.bf16.mxu0 %vm5476_vm1, %v5475_v7  ;;  %v5390_v23 = vpop.eup %5389 }
 0x47c   :  { %v5392_v27 = vpop.eup %5391  ;;  %v1493_v32 = vmul.f32 %v5390_v23, %v5848_v6 }
 0x47d   :  { %v971_v5 = vrot.slane %v964_v1, %v5586_v37  ;;  %v979_v9 = vrot.slane %v4837_v60, %v5586_v37  ;;  %v987_v11 = vrot.slane %v980_v62, %v5586_v37  ;;  %v995_v14 = vrot.slane %v4838_v3, %v5586_v37 }
 0x47e   :  { %v1494_v35 = vmul.f32 %v5392_v27, %v5850_v8  ;;  %v1501_v40 = vpack.c.bf16 %v1493_v32, %v1493_v32 }
 0x47f   :  { %v996_v16 = vcombine.low %v971_v5, %v979_v9  ;;  %v1012_v18 = vcombine.low %v987_v11, %v995_v14  ;;  %v997_v15 = vcombine.high %v971_v5, %v979_v9  ;;  %v1013_v21 = vcombine.high %v987_v11, %v995_v14 }
 0x480   :  { %v1502_v41 = vpack.c.bf16 %v1494_v35, %v1494_v35 }
 0x481   :  { %v1004_v24 = vrot.slane %v996_v16, %v5591_v43  ;;  %v1020_v57 = vrot.slane %v1012_v18, %v5591_v43  ;;  %v1011_v2 = vrot.slane %v997_v15, %v5591_v43  ;;  %v1027_v26 = vrot.slane %v1013_v21, %v5591_v43 }
 0x483   :  { %v1028_v28 = vcombine.low %v1004_v24, %v1020_v57  ;;  %v1029_v34 = vcombine.high %v1004_v24, %v1020_v57  ;;  %v1030_v20 = vcombine.low %v1011_v2, %v1027_v26  ;;  %v1031_v29 = vcombine.high %v1011_v2, %v1027_v26 }
 0x485   :  { %v1036_v30 = vpack.c.bf16 %v1028_v28, %v1028_v28  ;;  %v1037_v31 = vpack.c.bf16 %v1029_v34, %v1029_v34  ;;  %v1038_v36 = vpack.c.bf16 %v1030_v20, %v1030_v20  ;;  %v1039_v38 = vpack.c.bf16 %v1031_v29, %v1031_v29 }
 0x487   :  { %v1694_v17 = vsel %vm1508_vm3, %v1036_v30, 0  ;;  %v1740_v39 = vsel %vm1508_vm3, %v1037_v31, 0  ;;  %v1786_v6 = vsel %vm1508_vm3, %v1038_v36, 0  ;;  %v1832_v8 = vsel %vm1508_vm3, %v1039_v38, 0 }
 0x488   :  { %5115 = vmatpush3.bf16.msra.mxu1 %v1694_v17  ;;  %5121 = vmatpush3.bf16.msra.mxu0 %v1740_v39 }
 0x489   :  { %5126 = vmatprep.subr.bf16.mxu1 %v5475_v7  ;;  %5132 = vmatprep.subr.bf16.mxu0 %v5475_v7 }
 0x48b   :  { %5117 = vmatmul.mubr.msk.bf16.vlgmr.msra.gmra.mxu1 %vm1040_vm2, %v1501_v40  ;;  %5123 = vmatmul.mubr.msk.bf16.vlgmr.msra.gmra.mxu0 %vm1040_vm2, %v1502_v41 }
 0x48c   :  { %5127 = vmatpush3.bf16.msra.mxu1 %v1786_v6  ;;  %5133 = vmatpush3.bf16.msra.mxu0 %v1832_v8 }
 0x48d   :  { %5128 = vmatprep.mubr.msk.bf16.mxu1 %vm5476_vm1, %v5475_v7  ;;  %5134 = vmatprep.mubr.msk.bf16.mxu0 %vm5476_vm1, %v5475_v7 }
 0x48e   :  { %5138 = vmatprep.subr.bf16.mxu1 %v5475_v7  ;;  %5146 = vmatprep.subr.bf16.mxu0 %v5475_v7 }
 0x4a2   :  { %v1480_v42 = vpop.xlane.xlu0 %1479 }
 0x4a3   :  { %v1477_v44 = vpop.xlane.xlu1 %1476  ;;  %5393 = vrcp.f32 %v1480_v42 }
 0x4a4   :  { %5395 = vrcp.f32 %v1477_v44 }
 0x4b0   :  { %v5394_v19 = vpop.eup %5393 }
 0x4b1   :  { %v5396_v45 = vpop.eup %5395  ;;  %v1496_v46 = vmul.f32 %v5394_v19, %v5861_v10 }
 0x4b2   :  { %v1495_v22 = vmul.f32 %v5396_v45, %v5863_v33 }
 0x4b3   :  { %v1504_v49 = vpack.c.bf16 %v1496_v46, %v1496_v46 }
 0x4b4   :  { %v1503_v13 = vpack.c.bf16 %v1495_v22, %v1495_v22 }
 0x4b5   :  { %5135 = vmatmul.mubr.msk.bf16.vlgmr.msra.gmra.mxu0 %vm1040_vm2, %v1504_v49 }
 0x4b6   :  { %5129 = vmatmul.mubr.msk.bf16.vlgmr.msra.gmra.mxu1 %vm1040_vm2, %v1503_v13  ;;  %5150 = vmatprep.mubr.msk.bf16.mxu0 %vm5476_vm1, %v5475_v7 }
 0x4b7   :  { %5142 = vmatprep.mubr.msk.bf16.mxu1 %vm5476_vm1, %v5475_v7 }
 0x530   :  { %v1546_v51 = vpop.f32.mrf.mxu1 }
 0x531   :  { %v1592_v52 = vpop.f32.mrf.mxu0 }
 0x532   :  { %v5094_v53 = vpop.f32.mrf.mxu1 }
 0x533   :  { %v5100_v12 = vpop.f32.mrf.mxu0 }
 0x534   :  { %v1549_v4 = vpop.f32.mrf.mxu1 }
 0x535   :  { %v1595_v10 = vpop.f32.mrf.mxu0 }
 0x536   :  { %v5095_v54 = vpop.f32.mrf.mxu1 }
 0x537   :  { %v5101_v33 = vpop.f32.mrf.mxu0 }
 0x538   :  { %v1638_v55 = vpop.f32.mrf.mxu1 }
 0x539   :  { %v1874_v56 = vcombine.low %v1546_v51, %v1638_v55  ;;  %v1875_v48 = vcombine.high %v1546_v51, %v1638_v55 }
 0x53a   :  { %v1684_v25 = vpop.f32.mrf.mxu0  ;;  %v5106_v58 = vpop.f32.mrf.mxu1 }
 0x53b   :  { %v1882_v59 = vrot.slane %v1874_v56, %v5586_v37  ;;  %v1889_v61 = vrot.slane %v1875_v48, %v5586_v37  ;;  %v1890_v47 = vcombine.low %v1592_v52, %v1684_v25  ;;  %v1891_v63 = vcombine.high %v1592_v52, %v1684_v25 }
 0x53c   :  { %v5112_v50 = vpop.f32.mrf.mxu0  ;;  %v1641_v0 = vpop.f32.mrf.mxu1 }
 0x53d   :  { %v1898_v1 = vrot.slane %v1890_v47, %v5586_v37  ;;  %v1905_v60 = vrot.slane %v1891_v63, %v5586_v37 }
 0x53e   :  { %v1687_v62 = vpop.f32.mrf.mxu0  ;;  %v5107_v3 = vpop.f32.mrf.mxu1 }
 0x53f   :  { %v1906_v5 = vcombine.low %v1882_v59, %v1898_v1  ;;  %v1907_v9 = vcombine.high %v1882_v59, %v1898_v1  ;;  %v1922_v11 = vcombine.low %v1889_v61, %v1905_v60  ;;  %v1923_v14 = vcombine.high %v1889_v61, %v1905_v60 }
 0x540   :  { %v5113_v16 = vpop.f32.mrf.mxu0 }
 0x541   :  { %v1914_v18 = vrot.slane %v1906_v5, %v5591_v43  ;;  %v1921_v15 = vrot.slane %v1907_v9, %v5591_v43  ;;  %v1930_v21 = vrot.slane %v1922_v11, %v5591_v43  ;;  %v1937_v23 = vrot.slane %v1923_v14, %v5591_v43  ;;  %v5343_v16 = vld [vmem:[%s6558_s3 + $0x8] sm:$0xff]  }
 0x542   :  { %5139 = vmatpush3.bf16.msra.mxu1 %v5343_v16 }
 0x543   :  { %v2010_v24 = vcombine.low %v1914_v18, %v1921_v15  ;;  %v4855_v57 = vcombine.high %v1914_v18, %v1921_v15  ;;  %v2026_v2 = vcombine.low %v1930_v21, %v1937_v23  ;;  %v4856_v26 = vcombine.high %v1930_v21, %v1937_v23  ;;  %5140 = vmatprep.subr.bf16.mxu1 %v5475_v7 }
 0x545   :  { %v2017_v27 = vrot.slane %v2010_v24, %v5586_v37  ;;  %v2025_v28 = vrot.slane %v4855_v57, %v5586_v37  ;;  %v2033_v34 = vrot.slane %v2026_v2, %v5586_v37  ;;  %v2041_v20 = vrot.slane %v4856_v26, %v5586_v37 }
 0x547   :  { %v2043_v29 = vcombine.high %v2017_v27, %v2025_v28  ;;  %v2059_v30 = vcombine.high %v2033_v34, %v2041_v20  ;;  %v2042_v31 = vcombine.low %v2017_v27, %v2025_v28  ;;  %v2058_v32 = vcombine.low %v2033_v34, %v2041_v20 }
 0x549   :  { %v5944_v35 = vrot.slane %v2043_v29, %v5591_v43  ;;  %v5947_v17 = vrot.slane %v2059_v30, %v5591_v43  ;;  %v5950_v39 = vrot.slane %v2042_v31, %v5591_v43  ;;  %v5953_v36 = vrot.slane %v2058_v32, %v5591_v43  ;;  %v5344_v29 = vld [vmem:[%s6558_s3] sm:$0xff]  }
 0x54a   :  { %5141 = vmatpush3.bf16.msra.mxu1 %v5344_v29 }
 0x54b   :  { %v1730_v38 = vpop.f32.mrf.mxu1  ;;  %v1776_v40 = vpop.f32.mrf.mxu0  ;;  %v2076_v41 = vcombine.low %v5944_v35, %v5947_v17  ;;  %v2074_v6 = vcombine.low %v5950_v39, %v5953_v36  ;;  %v2075_v8 = vcombine.high %v5950_v39, %v5953_v36  ;;  %v2077_v42 = vcombine.high %v5944_v35, %v5947_v17  ;;  %5154 = vmatprep.subr.bf16.mxu1 %v5475_v7  ;;  %v5443_v36 = vld [vmem:[%s6555_s0] sm:$0xff] }
 0x54d   :  { %v5118_v44 = vpop.f32.mrf.mxu1  ;;  %v5124_v19 = vpop.f32.mrf.mxu0 }
 0x54f   :  { %v1733_v45 = vpop.f32.mrf.mxu1  ;;  %v1779_v46 = vpop.f32.mrf.mxu0 }
 0x551   :  { %v5119_v22 = vpop.f32.mrf.mxu1  ;;  %v5125_v49 = vpop.f32.mrf.mxu0 }
 0x575   :  { %v1868_v13 = vpop.f32.mrf.mxu0 }
 0x576   :  { %v1822_v51 = vpop.f32.mrf.mxu1  ;;  %v1958_v52 = vcombine.low %v1776_v40, %v1868_v13  ;;  %v1959_v53 = vcombine.high %v1776_v40, %v1868_v13 }
 0x577   :  { %v1942_v12 = vcombine.low %v1730_v38, %v1822_v51  ;;  %v1943_v4 = vcombine.high %v1730_v38, %v1822_v51  ;;  %v5136_v10 = vpop.f32.mrf.mxu0 }
 0x578   :  { %v1966_v54 = vrot.slane %v1958_v52, %v5586_v37  ;;  %v1973_v33 = vrot.slane %v1959_v53, %v5586_v37  ;;  %v5130_v55 = vpop.f32.mrf.mxu1 }
 0x579   :  { %v1950_v56 = vrot.slane %v1942_v12, %v5586_v37  ;;  %v1957_v48 = vrot.slane %v1943_v4, %v5586_v37  ;;  %v1871_v25 = vpop.f32.mrf.mxu0 }
 0x57a   :  { %v1825_v58 = vpop.f32.mrf.mxu1 }
 0x57b   :  { %v1974_v59 = vcombine.low %v1950_v56, %v1966_v54  ;;  %v1975_v61 = vcombine.high %v1950_v56, %v1966_v54  ;;  %v1990_v47 = vcombine.low %v1957_v48, %v1973_v33  ;;  %v1991_v63 = vcombine.high %v1957_v48, %v1973_v33  ;;  %v5137_v50 = vpop.f32.mrf.mxu0  ;;  %v5444_v56 = vld [vmem:[%s6555_s0 + $0x8] sm:$0xff] }
 0x57c   :  { %v5131_v0 = vpop.f32.mrf.mxu1  ;;  %v5347_v50 = vld [vmem:[%s6560_s5 + $0x18] sm:$0xff]  }
 0x57d   :  { %v1982_v1 = vrot.slane %v1974_v59, %v5591_v43  ;;  %v1989_v60 = vrot.slane %v1975_v61, %v5591_v43  ;;  %v1998_v62 = vrot.slane %v1990_v47, %v5591_v43  ;;  %v2005_v3 = vrot.slane %v1991_v63, %v5591_v43  ;;  %v5345_v47 = vld [vmem:[%s6559_s4 + $0x8] sm:$0xff]   ;;  %v5346_v63 = vld [vmem:[%s6559_s4] sm:$0xff]   ;;  %v5348_v0 = vld [vmem:[%s6560_s5 + $0x10] sm:$0xff]  }
 0x57e   :  { %5147 = vmatpush3.bf16.msra.mxu0 %v5345_v47 }
 0x57f   :  { %v2078_v5 = vcombine.low %v1982_v1, %v1989_v60  ;;  %v4857_v9 = vcombine.high %v1982_v1, %v1989_v60  ;;  %v2094_v11 = vcombine.low %v1998_v62, %v2005_v3  ;;  %v4858_v14 = vcombine.high %v1998_v62, %v2005_v3  ;;  %5148 = vmatprep.subr.bf16.mxu0 %v5475_v7 }
 0x581   :  { %v2085_v18 = vrot.slane %v2078_v5, %v5586_v37  ;;  %v2093_v15 = vrot.slane %v4857_v9, %v5586_v37  ;;  %v2101_v21 = vrot.slane %v2094_v11, %v5586_v37  ;;  %v2109_v23 = vrot.slane %v4858_v14, %v5586_v37 }
 0x582   :  { %5149 = vmatpush3.bf16.msra.mxu0 %v5346_v63 }
 0x583   :  { %v2111_v24 = vcombine.high %v2085_v18, %v2093_v15  ;;  %v2127_v57 = vcombine.high %v2101_v21, %v2109_v23  ;;  %v2110_v2 = vcombine.low %v2085_v18, %v2093_v15  ;;  %v2126_v26 = vcombine.low %v2101_v21, %v2109_v23  ;;  %5166 = vmatprep.subr.bf16.mxu0 %v5475_v7  ;;  %v4862_v18 = vld [vmem:[%s6562_s7] ss:$0 sm:$0xff] }
 0x585   :  { %v2125_v27 = vrot.slane %v2111_v24, %v5591_v43  ;;  %v2141_v28 = vrot.slane %v2127_v57, %v5591_v43  ;;  %v2118_v34 = vrot.slane %v2110_v2, %v5591_v43  ;;  %v2134_v20 = vrot.slane %v2126_v26, %v5591_v43  ;;  %v5349_v57 = vld [vmem:[%s6560_s5 + $0x8] sm:$0xff]   ;;  %v5350_v2 = vld [vmem:[%s6560_s5] sm:$0xff]  }
 0x587   :  { %v2144_v30 = vcombine.low %v2125_v27, %v2141_v28  ;;  %v2143_v31 = vcombine.high %v2118_v34, %v2134_v20  ;;  %v2142_v32 = vcombine.low %v2118_v34, %v2134_v20  ;;  %v2145_v44 = vcombine.high %v2125_v27, %v2141_v28 }
 0x589   :  { %v5316_v38 = vpack.i.bf16 %v2144_v30, %v2076_v41  ;;  %v5311_v40 = vpack.i.bf16 %v2143_v31, %v2075_v8  ;;  %v5321_v19 = vpack.i.bf16 %v2145_v44, %v2077_v42 }
 0x58b   :  { %5317 = vrot.lane.b32.xlu1 %v5316_v38, %s5484_s28  ;;  %5312 = vrot.lane.b32.xlu0 %v5311_v40, %s5485_s29 }
 0x58f   :  { %5322 = vrot.lane.b32.xlu1 %v5321_v19, %s5486_s30 }
 0x5fd   :  { %v5318_v45 = vpop.permute.xlu1 %5317  ;;  %v5313_v46 = vpop.permute.xlu0 %5312 }
 0x5fe   :  { %v5315_v22 = vunpack.i.h.bf16 %v5313_v46  ;;  %v5314_v49 = vunpack.i.l.bf16 %v5313_v46  ;;  %v5320_v41 = vunpack.i.h.bf16 %v5318_v45  ;;  %v5319_v8 = vunpack.i.l.bf16 %v5318_v45 }
 0x600   :  { %v2170_v13 = vsel %vm1040_vm2, %v2074_v6, %v5314_v49  ;;  %v2171_v51 = vsel %vm1040_vm2, %v2142_v32, %v5315_v22 }
 0x601   :  { %v5323_v35 = vpop.permute.xlu1 %5322  ;;  %v2173_v52 = vsel %vm2172_vm4, %v2170_v13, %v5319_v8  ;;  %v2174_v53 = vsel %vm2172_vm4, %v2171_v51, %v5320_v41  ;;  %v5351_v41 = vld [vmem:[%s6557_s2 + $0x18] sm:$0xff]   ;;  %v5352_v8 = vld [vmem:[%s6557_s2 + $0x10] sm:$0xff]  }
 0x602   :  { %v5325_v17 = vunpack.i.h.bf16 %v5323_v35  ;;  %v5324_v42 = vunpack.i.l.bf16 %v5323_v35 }
 0x604   :  { %v2176_v12 = vsel %vm2175_vm5, %v2173_v52, %v5324_v42  ;;  %v2177_v4 = vsel %vm2175_vm5, %v2174_v53, %v5325_v17 }
 0x605   :  { %v2178_v10 = vpack.c.bf16 %v2177_v4, %v2176_v12 }
 0x607   :  { %5143 = vmatmul.mubr.msk.bf16.vlgmr.msra.gmra.mxu1 %vm47_vm0, %v2178_v10  ;;  %v4872_v10 = vld [vmem:[%s6561_s6 + $0x1] ss:$0 sm:$0xff] }
 0x608   :  { %5162 = vmatprep.mubr.msk.bf16.mxu1 %vm5476_vm1, %v5475_v7  ;;  %5155 = vmatpush3.bf16.msra.mxu1 %v5347_v50 }
 0x609   :  { %5156 = vmatprep.subr.bf16.mxu1 %v5475_v7 }
 0x60c   :  { %5157 = vmatpush3.bf16.msra.mxu1 %v5348_v0 }
 0x60d   :  { %5158 = vmatprep.subr.bf16.mxu1 %v5475_v7 }
 0x610   :  { %5159 = vmatpush3.bf16.msra.mxu1 %v5349_v57 }
 0x611   :  { %5160 = vmatprep.subr.bf16.mxu1 %v5475_v7 }
 0x614   :  { %5161 = vmatpush3.bf16.msra.mxu1 %v5350_v2 }
 0x615   :  { %5180 = vmatprep.subr.bf16.mxu1 %v5475_v7 }
 0x6c7   :  { %v2232_v39 = vpop.f32.mrf.mxu1 }
 0x6c8   :  { %v2239_v6 = vadd.f32 %v5443_v36, %v2232_v39 }
 0x6c9   :  { %v5144_v54 = vpop.f32.mrf.mxu1 }
 0x6ca   :  { %v2242_v33 = vmul.f32 %v2239_v6, %v2239_v6 }
 0x6cb   :  { %v2235_v55 = vpop.f32.mrf.mxu1 }
 0x6cc   :  { %v2240_v48 = vadd.f32 %v5444_v56, %v2235_v55  ;;  %v2244_v25 = vsel %vm47_vm0, %v2242_v33, 0.0 }
 0x6cd   :  { %2245 = vadd.xlane.f32.xlu0 %v2244_v25  ;;  %v5145_v58 = vpop.f32.mrf.mxu1 }
 0x6ce   :  { %v2243_v59 = vmul.f32 %v2240_v48, %v2240_v48 }
 0x6d0   :  { %v2247_v61 = vsel %vm47_vm0, %v2243_v59, 0.0 }
 0x6d1   :  { %2248 = vadd.xlane.f32.xlu1 %v2247_v61 }
 0x756   :  { %v2246_v1 = vpop.xlane.xlu0 %2245 }
 0x757   :  { %v2250_v60 = vmul.f32 0.03125, %v2246_v1 }
 0x759   :  { %v2252_v62 = vadd.f32 1e-06, %v2250_v60 }
 0x75a   :  { %v2249_v3 = vpop.xlane.xlu1 %2248 }
 0x75b   :  { %5397 = vrsqrt.f32 %v2252_v62  ;;  %v2251_v5 = vmul.f32 0.03125, %v2249_v3 }
 0x75d   :  { %v2253_v9 = vadd.f32 1e-06, %v2251_v5 }
 0x75f   :  { %5399 = vrsqrt.f32 %v2253_v9 }
 0x768   :  { %v5398_v11 = vpop.eup %5397 }
 0x769   :  { %v2256_v14 = vmul.f32 %v5398_v11, %v2239_v6 }
 0x76b   :  { %v2264_v21 = vmul.f32 %v4862_v18, %v2256_v14 }
 0x76c   :  { %v5400_v16 = vpop.eup %5399 }
 0x76d   :  { %v2257_v15 = vmul.f32 %v5400_v16, %v2240_v48 }
 0x76f   :  { %v2265_v23 = vmul.f32 %v4862_v18, %v2257_v15 }
 0x771   :  { %v2266_v24 = vpack.c.bf16 %v2265_v23, %v2264_v21 }
 0x773   :  { %5151 = vmatmul.mubr.msk.bf16.vlgmr.msra.gmra.mxu0 %vm47_vm0, %v2266_v24 }
 0x774   :  { %5170 = vmatprep.mubr.msk.bf16.mxu0 %vm5476_vm1, %v5475_v7  ;;  %5167 = vmatpush3.bf16.msra.mxu0 %v5351_v41 }
 0x775   :  { %5168 = vmatprep.subr.bf16.mxu0 %v5475_v7 }
 0x778   :  { %5169 = vmatpush3.bf16.msra.mxu0 %v5352_v8 }
 0x779   :  { %5174 = vmatprep.subr.bf16.mxu0 %v5475_v7 }
 0x833   :  { %v2320_v26 = vpop.f32.mrf.mxu0 }
 0x834   :  { %v2327_v34 = vmax.f32 %v2320_v26, 0.0 }
 0x835   :  { %v5152_v27 = vpop.f32.mrf.mxu0 }
 0x837   :  { %v2323_v28 = vpop.f32.mrf.mxu0 }
 0x838   :  { %v2328_v20 = vmax.f32 %v2323_v28, 0.0 }
 0x839   :  { %v5153_v29 = vpop.f32.mrf.mxu0 }
 0x83a   :  { %v2329_v30 = vpack.c.bf16 %v2328_v20, %v2327_v34 }
 0x83c   :  { %5163 = vmatmul.mubr.msk.bf16.vlgmr.msra.gmra.mxu1 %vm2362_vm6, %v2329_v30 }
 0x83d   :  { %5182 = vmatprep.mubr.msk.bf16.mxu1 %vm5476_vm1, %v5475_v7 }
 0x8fc   :  { %v2400_v31 = vpop.f32.mrf.mxu1 }
 0x8fd   :  { %v6046_v32 = vadd.f32 %v2400_v31, %v2239_v6 }
 0x8fe   :  { %v5164_v38 = vpop.f32.mrf.mxu1 }
 0x8ff   :  { %v2411_v40 = vmul.f32 %v6046_v32, %v6046_v32 }
 0x900   :  { %v2403_v44 = vpop.f32.mrf.mxu1 }
 0x901   :  { %v6050_v19 = vadd.f32 %v2403_v44, %v2240_v48  ;;  %v2413_v45 = vsel %vm47_vm0, %v2411_v40, 0.0 }
 0x902   :  { %2414 = vadd.xlane.f32.xlu0 %v2413_v45  ;;  %v5165_v46 = vpop.f32.mrf.mxu1 }
 0x903   :  { %v2412_v22 = vmul.f32 %v6050_v19, %v6050_v19 }
 0x905   :  { %v2416_v49 = vsel %vm47_vm0, %v2412_v22, 0.0 }
 0x906   :  { %2417 = vadd.xlane.f32.xlu0 %v2416_v49 }
 0x98b   :  { %v2415_v13 = vpop.xlane.xlu0 %2414 }
 0x98c   :  { %v2419_v51 = vmul.f32 0.03125, %v2415_v13 }
 0x98e   :  { %v2421_v35 = vadd.f32 1e-06, %v2419_v51 }
 0x98f   :  { %v2418_v17 = vpop.xlane.xlu0 %2417 }
 0x990   :  { %5401 = vrsqrt.f32 %v2421_v35  ;;  %v2420_v42 = vmul.f32 0.03125, %v2418_v17 }
 0x992   :  { %v2422_v52 = vadd.f32 1e-06, %v2420_v42 }
 0x994   :  { %5403 = vrsqrt.f32 %v2422_v52 }
 0x99d   :  { %v5402_v53 = vpop.eup %5401 }
 0x99e   :  { %v2425_v12 = vmul.f32 %v5402_v53, %v6046_v32 }
 0x9a0   :  { %v2433_v36 = vmul.f32 %v4872_v10, %v2425_v12 }
 0x9a1   :  { %v5404_v4 = vpop.eup %5403 }
 0x9a2   :  { %v2426_v39 = vmul.f32 %v5404_v4, %v6050_v19 }
 0x9a4   :  { %v2434_v6 = vmul.f32 %v4872_v10, %v2426_v39 }
 0x9a6   :  { %v2435_v54 = vpack.c.bf16 %v2434_v6, %v2433_v36 }
 0x9a8   :  { %5171 = vmatmul.mubr.msk.bf16.vlgmr.msra.gmra.mxu0 %vm47_vm0, %v2435_v54 }
 0x9a9   :  { %5176 = vmatprep.mubr.msk.bf16.mxu0 %vm5476_vm1, %v5475_v7 }
 0xa68   :  { %v2490_v33 = vpop.f32.mrf.mxu0 }
 0xa69   :  { %2505 = vrot.lane.b32.xlu0 %v2490_v33, %s5479_s21  ;;  %2499 = vrot.lane.b32.xlu1 %v2490_v33, %s5478_s20 }
 0xa6a   :  { %v5172_v55 = vpop.f32.mrf.mxu0 }
 0xa6c   :  { %v6074_v56 = vpop.f32.mrf.mxu0 }
 0xa6d   :  { %2511 = vrot.lane.b32.xlu1 %v2490_v33, %s5477_s19  ;;  %2507 = vrot.lane.b32.xlu0 %v6074_v56, %s5479_s21 }
 0xa6e   :  { %v5173_v48 = vpop.f32.mrf.mxu0 }
 0xa71   :  { %2797 = vrot.lane.b32.xlu0 %v2490_v33, %s5480_s22  ;;  %2501 = vrot.lane.b32.xlu1 %v6074_v56, %s5478_s20 }
 0xa75   :  { %2513 = vrot.lane.b32.xlu1 %v6074_v56, %s5477_s19 }
 0xadb   :  { %v6084_v25 = vpop.permute.xlu0 %2505  ;;  %v6086_v58 = vpop.permute.xlu1 %2499 }
 0xadc   :  { %2805 = vrot.lane.b32.xlu0 %v6084_v25, %s5480_s22  ;;  %2801 = vrot.lane.b32.xlu1 %v6086_v58, %s5480_s22  ;;  %v2517_v1 = vcombine.low %v2490_v33, %v6084_v25  ;;  %v2518_v60 = vcombine.high %v2490_v33, %v6084_v25 }
 0xade   :  { %v2525_v5 = vrot.slane %v2517_v1, %v5586_v37  ;;  %v2532_v9 = vrot.slane %v2518_v60, %v5586_v37 }
 0xadf   :  { %v6092_v59 = vpop.permute.xlu1 %2511  ;;  %v6098_v61 = vpop.permute.xlu0 %2507 }
 0xae0   :  { %2799 = vrot.lane.b32.xlu0 %v6074_v56, %s5480_s22  ;;  %2809 = vrot.lane.b32.xlu1 %v6092_v59, %s5480_s22  ;;  %v2533_v50 = vcombine.low %v6086_v58, %v6092_v59  ;;  %v2534_v0 = vcombine.high %v6086_v58, %v6092_v59  ;;  %v2585_v29 = vcombine.low %v6074_v56, %v6098_v61 }
 0xae1   :  { %v2586_v30 = vcombine.high %v6074_v56, %v6098_v61 }
 0xae2   :  { %v2541_v62 = vrot.slane %v2533_v50, %v5586_v37  ;;  %v2548_v3 = vrot.slane %v2534_v0, %v5586_v37  ;;  %v2593_v35 = vrot.slane %v2585_v29, %v5586_v37 }
 0xae3   :  { %v6100_v47 = vpop.permute.xlu1 %2501  ;;  %v2798_v15 = vpop.permute.xlu0 %2797  ;;  %v6147_v17 = vrot.slane %v2586_v30, %v5586_v37 }
 0xae4   :  { %2807 = vrot.lane.b32.xlu0 %v6098_v61, %s5480_s22  ;;  %2803 = vrot.lane.b32.xlu1 %v6100_v47, %s5480_s22  ;;  %v2549_v11 = vcombine.low %v2525_v5, %v2541_v62  ;;  %v2550_v14 = vcombine.high %v2525_v5, %v2541_v62  ;;  %v2565_v16 = vcombine.low %v2532_v9, %v2548_v3 }
 0xae5   :  { %v2566_v18 = vcombine.high %v2532_v9, %v2548_v3 }
 0xae6   :  { %v2557_v21 = vrot.slane %v2549_v11, %v5591_v43  ;;  %v2564_v23 = vrot.slane %v2550_v14, %v5591_v43  ;;  %v2573_v24 = vrot.slane %v2565_v16, %v5591_v43 }
 0xae7   :  { %v6106_v63 = vpop.permute.xlu1 %2513  ;;  %v2580_v57 = vrot.slane %v2566_v18, %v5591_v43 }
 0xae8   :  { %2811 = vrot.lane.b32.xlu1 %v6106_v63, %s5480_s22  ;;  %v2653_v27 = vcombine.low %v2557_v21, %v2564_v23  ;;  %v4880_v28 = vcombine.high %v2557_v21, %v2564_v23  ;;  %v2601_v31 = vcombine.low %v6100_v47, %v6106_v63  ;;  %v2602_v38 = vcombine.high %v6100_v47, %v6106_v63 }
 0xae9   :  { %v2669_v34 = vcombine.low %v2573_v24, %v2580_v57  ;;  %v4881_v20 = vcombine.high %v2573_v24, %v2580_v57 }
 0xaea   :  { %v6134_v46 = vrot.slane %v2653_v27, %v5586_v37  ;;  %v6137_v22 = vrot.slane %v4880_v28, %v5586_v37  ;;  %v2609_v42 = vrot.slane %v2601_v31, %v5586_v37  ;;  %v2616_v52 = vrot.slane %v2602_v38, %v5586_v37 }
 0xaeb   :  { %v6140_v49 = vrot.slane %v2669_v34, %v5586_v37  ;;  %v6143_v41 = vrot.slane %v4881_v20, %v5586_v37 }
 0xaec   :  { %3101 = vrot.lane.b32.xlu1 %v2490_v33, %s5483_s23  ;;  %v2685_v36 = vcombine.low %v6134_v46, %v6137_v22  ;;  %v2686_v54 = vcombine.high %v6134_v46, %v6137_v22  ;;  %v2617_v60 = vcombine.low %v2593_v35, %v2609_v42  ;;  %v2618_v62 = vcombine.high %v2593_v35, %v2609_v42 }
 0xaed   :  { %v2701_v6 = vcombine.low %v6140_v49, %v6143_v41  ;;  %v2702_v33 = vcombine.high %v6140_v49, %v6143_v41  ;;  %v2633_v3 = vcombine.low %v6147_v17, %v2616_v52  ;;  %v2634_v5 = vcombine.high %v6147_v17, %v2616_v52 }
 0xaee   :  { %v2693_v23 = vrot.slane %v2685_v36, %v5591_v43  ;;  %v6172_v28 = vrot.slane %v2617_v60, %v5591_v43  ;;  %v6175_v34 = vrot.slane %v2618_v62, %v5591_v43 }
 0xaef   :  { %v2709_v24 = vrot.slane %v2701_v6, %v5591_v43  ;;  %v2648_v60 = vrot.slane %v2634_v5, %v5591_v43 }
 0xb4e   :  { %v2806_v2 = vpop.permute.xlu0 %2805  ;;  %v2802_v26 = vpop.permute.xlu1 %2801 }
 0xb4f   :  { %v2821_v40 = vcombine.low %v2798_v15, %v2806_v2  ;;  %v2822_v44 = vcombine.high %v2798_v15, %v2806_v2 }
 0xb51   :  { %v2829_v53 = vrot.slane %v2821_v40, %v5586_v37  ;;  %v2836_v12 = vrot.slane %v2822_v44, %v5586_v37 }
 0xb52   :  { %v2800_v45 = vpop.permute.xlu0 %2799  ;;  %v2810_v8 = vpop.permute.xlu1 %2809 }
 0xb53   :  { %v2837_v13 = vcombine.low %v2802_v26, %v2810_v8  ;;  %v2838_v51 = vcombine.high %v2802_v26, %v2810_v8 }
 0xb55   :  { %v2845_v4 = vrot.slane %v2837_v13, %v5586_v37  ;;  %v2852_v10 = vrot.slane %v2838_v51, %v5586_v37 }
 0xb56   :  { %v2804_v39 = vpop.permute.xlu1 %2803  ;;  %v2808_v1 = vpop.permute.xlu0 %2807 }
 0xb57   :  { %v2853_v55 = vcombine.low %v2829_v53, %v2845_v4  ;;  %v2854_v48 = vcombine.high %v2829_v53, %v2845_v4  ;;  %v2869_v50 = vcombine.low %v2836_v12, %v2852_v10  ;;  %v2870_v0 = vcombine.high %v2836_v12, %v2852_v10 }
 0xb58   :  { %v2889_v18 = vcombine.low %v2800_v45, %v2808_v1  ;;  %v2890_v15 = vcombine.high %v2800_v45, %v2808_v1  ;;  %v2641_v1 = vrot.slane %v2633_v3, %v5591_v43 }
 0xb59   :  { %v2861_v9 = vrot.slane %v2853_v55, %v5591_v43  ;;  %v2868_v11 = vrot.slane %v2854_v48, %v5591_v43  ;;  %v2877_v14 = vrot.slane %v2869_v50, %v5591_v43  ;;  %v2884_v16 = vrot.slane %v2870_v0, %v5591_v43 }
 0xb5a   :  { %v2812_v21 = vpop.permute.xlu1 %2811  ;;  %v2897_v44 = vrot.slane %v2889_v18, %v5586_v37  ;;  %v2904_v45 = vrot.slane %v2890_v15, %v5586_v37 }
 0xb5b   :  { %v2957_v57 = vcombine.low %v2861_v9, %v2868_v11  ;;  %v4884_v2 = vcombine.high %v2861_v9, %v2868_v11  ;;  %v2973_v26 = vcombine.low %v2877_v14, %v2884_v16  ;;  %v4885_v27 = vcombine.high %v2877_v14, %v2884_v16 }
 0xb5c   :  { %v2905_v20 = vcombine.low %v2804_v39, %v2812_v21  ;;  %v2906_v29 = vcombine.high %v2804_v39, %v2812_v21 }
 0xb5d   :  { %v2964_v30 = vrot.slane %v2957_v57, %v5586_v37  ;;  %v2972_v31 = vrot.slane %v4884_v2, %v5586_v37  ;;  %v2980_v38 = vrot.slane %v2973_v26, %v5586_v37  ;;  %v2988_v40 = vrot.slane %v4885_v27, %v5586_v37 }
 0xb5e   :  { %v2913_v8 = vrot.slane %v2905_v20, %v5586_v37  ;;  %v2920_v13 = vrot.slane %v2906_v29, %v5586_v37  ;;  %v2717_v57 = vcombine.low %v2693_v23, %v2709_v24 }
 0xb5f   :  { %v2989_v51 = vcombine.low %v2964_v30, %v2972_v31  ;;  %v3005_v35 = vcombine.low %v2980_v38, %v2988_v40  ;;  %v2990_v17 = vcombine.high %v2964_v30, %v2972_v31  ;;  %v3006_v42 = vcombine.high %v2980_v38, %v2988_v40 }
 0xb60   :  { %v2921_v52 = vcombine.low %v2897_v44, %v2913_v8  ;;  %v2922_v53 = vcombine.high %v2897_v44, %v2913_v8  ;;  %v2937_v12 = vcombine.low %v2904_v45, %v2920_v13  ;;  %v2938_v4 = vcombine.high %v2904_v45, %v2920_v13 }
 0xb61   :  { %v2997_v10 = vrot.slane %v2989_v51, %v5591_v43  ;;  %v3013_v39 = vrot.slane %v3005_v35, %v5591_v43  ;;  %v3004_v36 = vrot.slane %v2990_v17, %v5591_v43  ;;  %v3020_v6 = vrot.slane %v3006_v42, %v5591_v43 }
 0xb62   :  { %v2929_v55 = vrot.slane %v2921_v52, %v5591_v43  ;;  %v2936_v48 = vrot.slane %v2922_v53, %v5591_v43  ;;  %v2945_v50 = vrot.slane %v2937_v12, %v5591_v43  ;;  %v2952_v0 = vrot.slane %v2938_v4, %v5591_v43 }
 0xb63   :  { %v3021_v62 = vcombine.low %v2997_v10, %v3013_v39  ;;  %v3022_v9 = vcombine.high %v2997_v10, %v3013_v39  ;;  %v3023_v2 = vcombine.low %v3004_v36, %v3020_v6  ;;  %v2718_v30 = vcombine.high %v2693_v23, %v2709_v24 }
 0xb64   :  { %v3025_v11 = vcombine.low %v2929_v55, %v2936_v48  ;;  %v4886_v14 = vcombine.high %v2929_v55, %v2936_v48  ;;  %v3041_v16 = vcombine.low %v2945_v50, %v2952_v0  ;;  %v4887_v18 = vcombine.high %v2945_v50, %v2952_v0 }
 0xb65   :  { %v3093_v15 = vpack.c.bf16 %v3021_v62, %v3021_v62  ;;  %v3094_v21 = vpack.c.bf16 %v3022_v9, %v3022_v9  ;;  %v3024_v31 = vcombine.high %v3004_v36, %v3020_v6  ;;  %v2721_v38 = vcombine.low %v6172_v28, %v6175_v34 }
 0xb66   :  { %v3032_v26 = vrot.slane %v3025_v11, %v5586_v37  ;;  %v3040_v27 = vrot.slane %v4886_v14, %v5586_v37  ;;  %v3048_v20 = vrot.slane %v3041_v16, %v5586_v37  ;;  %v3056_v3 = vrot.slane %v4887_v18, %v5586_v37 }
 0xb67   :  { %v3409_v5 = vsel %vm1040_vm2, %v3093_v15, 0  ;;  %v3455_v29 = vsel %vm1040_vm2, %v3094_v21, 0  ;;  %v4882_v45 = vcombine.high %v6172_v28, %v6175_v34  ;;  %v2737_v8 = vcombine.low %v2641_v1, %v2648_v60 }
 0xb68   :  { %5175 = vmatpush3.bf16.xpose.msra.mxu0 %v3409_v5  ;;  %5181 = vmatpush3.bf16.xpose.msra.mxu1 %v3455_v29  ;;  %v3057_v40 = vcombine.low %v3032_v26, %v3040_v27  ;;  %v3073_v44 = vcombine.low %v3048_v20, %v3056_v3  ;;  %v4883_v13 = vcombine.high %v2641_v1, %v2648_v60 }
 0xb69   :  { %5186 = vmatprep.subr.bf16.mxu0 %v5475_v7  ;;  %5192 = vmatprep.subr.bf16.mxu1 %v5475_v7  ;;  %v3095_v51 = vpack.c.bf16 %v3023_v2, %v3023_v2  ;;  %v3096_v35 = vpack.c.bf16 %v3024_v31, %v3024_v31  ;;  %v2789_v17 = vpack.c.bf16 %v2717_v57, %v2717_v57 }
 0xb6a   :  { %v3065_v23 = vrot.slane %v3057_v40, %v5591_v43  ;;  %v3081_v24 = vrot.slane %v3073_v44, %v5591_v43  ;;  %v2790_v42 = vpack.c.bf16 %v2718_v30, %v2718_v30  ;;  %v2700_v52 = vrot.slane %v2686_v54, %v5591_v43 }
 0xb6b   :  { %v2716_v28 = vrot.slane %v2702_v33, %v5591_v43  ;;  %v2728_v34 = vrot.slane %v2721_v38, %v5586_v37  ;;  %v2736_v53 = vrot.slane %v4882_v45, %v5586_v37  ;;  %v2744_v12 = vrot.slane %v2737_v8, %v5586_v37 }
 0xb6c   :  { %v2752_v4 = vrot.slane %v4883_v13, %v5586_v37  ;;  %v3501_v10 = vsel %vm1040_vm2, %v3095_v51, 0  ;;  %v3058_v39 = vcombine.high %v3032_v26, %v3040_v27  ;;  %v3547_v46 = vsel %vm1040_vm2, %v3096_v35, 0  ;;  %v5445_v51 = vld [vmem:[%s6556_s1] sm:$0xff] }
 0xb6d   :  { %v3089_v22 = vcombine.low %v3065_v23, %v3081_v24  ;;  %v3090_v49 = vcombine.high %v3065_v23, %v3081_v24  ;;  %v3074_v41 = vcombine.high %v3048_v20, %v3056_v3  ;;  %v2719_v54 = vcombine.low %v2700_v52, %v2716_v28  ;;  %v5446_v23 = vld [vmem:[%s6556_s1 + $0x8] sm:$0xff] }
 0xb6e   :  { %v2720_v33 = vcombine.high %v2700_v52, %v2716_v28  ;;  %v2753_v36 = vcombine.low %v2728_v34, %v2736_v53  ;;  %v2769_v6 = vcombine.low %v2744_v12, %v2752_v4  ;;  %v3072_v50 = vrot.slane %v3058_v39, %v5591_v43 }
 0xb6f   :  { %5177 = vmatmul.mubr.msk.bf16.vlgmr.msra.gmra.mxu0 %vm1040_vm2, %v2789_v17  ;;  %5183 = vmatmul.mubr.msk.bf16.vlgmr.msra.gmra.mxu1 %vm1040_vm2, %v2790_v42  ;;  %v3097_v55 = vpack.c.bf16 %v3089_v22, %v3089_v22  ;;  %v3098_v48 = vpack.c.bf16 %v3090_v49, %v3090_v49  ;;  %v3088_v0 = vrot.slane %v3074_v41, %v5591_v43 }
 0xb70   :  { %5187 = vmatpush3.bf16.xpose.msra.mxu0 %v3501_v10  ;;  %5193 = vmatpush3.bf16.xpose.msra.mxu1 %v3547_v46  ;;  %v2791_v1 = vpack.c.bf16 %v2719_v54, %v2719_v54  ;;  %v2792_v60 = vpack.c.bf16 %v2720_v33, %v2720_v33  ;;  %v2761_v62 = vrot.slane %v2753_v36, %v5591_v43  ;;  %v5447_v46 = vld [vmem:[%s6556_s1 + $0x10] sm:$0xff]  ;;  %v5448_v54 = vld [vmem:[%s6556_s1 + $0x18] sm:$0xff] }
 0xb71   :  { %5188 = vmatprep.mubr.msk.bf16.mxu0 %vm5476_vm1, %v5475_v7  ;;  %5194 = vmatprep.mubr.msk.bf16.mxu1 %vm5476_vm1, %v5475_v7  ;;  %v2777_v9 = vrot.slane %v2769_v6, %v5591_v43  ;;  %v3593_v11 = vsel %vm1040_vm2, %v3097_v55, 0  ;;  %v3639_v14 = vsel %vm1040_vm2, %v3098_v48, 0  ;;  %v3091_v16 = vcombine.low %v3072_v50, %v3088_v0 }
 0xb72   :  { %5198 = vmatprep.subr.bf16.mxu0 %v5475_v7  ;;  %5204 = vmatprep.subr.bf16.mxu1 %v5475_v7  ;;  %v3092_v18 = vcombine.high %v3072_v50, %v3088_v0  ;;  %v2754_v15 = vcombine.high %v2728_v34, %v2736_v53  ;;  %v2770_v2 = vcombine.high %v2744_v12, %v2752_v4 }
 0xb73   :  { %v2785_v21 = vcombine.low %v2761_v62, %v2777_v9  ;;  %v2786_v57 = vcombine.high %v2761_v62, %v2777_v9  ;;  %v3099_v26 = vpack.c.bf16 %v3091_v16, %v3091_v16  ;;  %v5449_v62 = vld [vmem:[%s6556_s1 + $0x20] sm:$0xff] }
 0xb74   :  { %v3100_v27 = vpack.c.bf16 %v3092_v18, %v3092_v18  ;;  %v2768_v5 = vrot.slane %v2754_v15, %v5591_v43  ;;  %v2784_v29 = vrot.slane %v2770_v2, %v5591_v43 }
 0xb75   :  { %v2793_v20 = vpack.c.bf16 %v2785_v21, %v2785_v21  ;;  %v2794_v3 = vpack.c.bf16 %v2786_v57, %v2786_v57  ;;  %v3685_v30 = vsel %vm1040_vm2, %v3099_v26, 0 }
 0xb76   :  { %v3731_v31 = vsel %vm1040_vm2, %v3100_v27, 0  ;;  %v2787_v38 = vcombine.low %v2768_v5, %v2784_v29  ;;  %v2788_v40 = vcombine.high %v2768_v5, %v2784_v29  ;;  %v5451_v5 = vld [vmem:[%s6556_s1 + $0x30] sm:$0xff] }
 0xb77   :  { %5189 = vmatmul.mubr.msk.bf16.vlgmr.msra.gmra.mxu0 %vm1040_vm2, %v2791_v1  ;;  %5195 = vmatmul.mubr.msk.bf16.vlgmr.msra.gmra.mxu1 %vm1040_vm2, %v2792_v60 }
 0xb78   :  { %5199 = vmatpush3.bf16.xpose.msra.mxu0 %v3593_v11  ;;  %5205 = vmatpush3.bf16.xpose.msra.mxu1 %v3639_v14  ;;  %v2795_v44 = vpack.c.bf16 %v2787_v38, %v2787_v38  ;;  %v2796_v45 = vpack.c.bf16 %v2788_v40, %v2788_v40  ;;  %v5450_v11 = vld [vmem:[%s6556_s1 + $0x28] sm:$0xff] }
 0xb79   :  { %5200 = vmatprep.mubr.msk.bf16.mxu0 %vm5476_vm1, %v5475_v7  ;;  %5206 = vmatprep.mubr.msk.bf16.mxu1 %vm5476_vm1, %v5475_v7 }
 0xb7a   :  { %5210 = vmatprep.subr.bf16.mxu0 %v5475_v7  ;;  %5216 = vmatprep.subr.bf16.mxu1 %v5475_v7 }
 0xb7f   :  { %5201 = vmatmul.mubr.msk.bf16.vlgmr.msra.gmra.mxu0 %vm1040_vm2, %v2793_v20  ;;  %5207 = vmatmul.mubr.msk.bf16.vlgmr.msra.gmra.mxu1 %vm1040_vm2, %v2794_v3 }
 0xb80   :  { %5211 = vmatpush3.bf16.xpose.msra.mxu0 %v3685_v30  ;;  %5217 = vmatpush3.bf16.xpose.msra.mxu1 %v3731_v31  ;;  %v5452_v30 = vld [vmem:[%s6556_s1 + $0x38] sm:$0xff] }
 0xb81   :  { %5212 = vmatprep.mubr.msk.bf16.mxu0 %vm5476_vm1, %v5475_v7  ;;  %5218 = vmatprep.mubr.msk.bf16.mxu1 %vm5476_vm1, %v5475_v7 }
 0xb82   :  { %5222 = vmatprep.subr.bf16.mxu0 %v5475_v7  ;;  %5228 = vmatprep.subr.bf16.mxu1 %v5475_v7 }
 0xb87   :  { %5213 = vmatmul.mubr.msk.bf16.vlgmr.msra.gmra.mxu0 %vm1040_vm2, %v2795_v44  ;;  %5219 = vmatmul.mubr.msk.bf16.vlgmr.msra.gmra.mxu1 %vm1040_vm2, %v2796_v45 }
 0xb88   :  { %5224 = vmatprep.mubr.msk.bf16.mxu0 %vm5476_vm1, %v5475_v7  ;;  %5230 = vmatprep.mubr.msk.bf16.mxu1 %vm5476_vm1, %v5475_v7 }
 0xc2f   :  { %v3445_v8 = vpop.f32.mrf.mxu0  ;;  %v3491_v13 = vpop.f32.mrf.mxu1 }
 0xc30   :  { %v6266_v35 = vadd.f32 %v5445_v51, %v3445_v8  ;;  %v6271_v24 = vadd.f32 %v5446_v23, %v3491_v13 }
 0xc31   :  { %v5178_v17 = vpop.f32.mrf.mxu0  ;;  %v5184_v42 = vpop.f32.mrf.mxu1 }
 0xc32   :  { %v3773_v52 = vsel %vm1040_vm2, %v6266_v35, -inf  ;;  %v3776_v28 = vsel %vm1040_vm2, %v6271_v24, -inf  ;;  %v3102_v17 = vpop.permute.xlu1 %3101 }
 0xc33   :  { %3774 = vmax.xlane.f32.xlu0 %v3773_v52  ;;  %v3448_v34 = vpop.f32.mrf.mxu0  ;;  %3777 = vmax.xlane.f32.xlu1 %v3776_v28  ;;  %v3494_v53 = vpop.f32.mrf.mxu1 }
 0xc35   :  { %v5179_v12 = vpop.f32.mrf.mxu0  ;;  %v5185_v4 = vpop.f32.mrf.mxu1 }
 0xc37   :  { %v3537_v10 = vpop.f32.mrf.mxu0  ;;  %v3583_v39 = vpop.f32.mrf.mxu1 }
 0xc38   :  { %v3538_v22 = vadd.f32 %v5447_v46, %v3537_v10  ;;  %v3584_v33 = vadd.f32 %v5448_v54, %v3583_v39 }
 0xc39   :  { %v5190_v49 = vpop.f32.mrf.mxu0  ;;  %v5196_v41 = vpop.f32.mrf.mxu1 }
 0xc3a   :  { %v3779_v36 = vsel %vm1040_vm2, %v3538_v22, -inf  ;;  %v3782_v0 = vsel %vm1040_vm2, %v3584_v33, -inf }
 0xc3b   :  { %3780 = vmax.xlane.f32.xlu0 %v3779_v36  ;;  %v3540_v6 = vpop.f32.mrf.mxu0  ;;  %v3586_v55 = vpop.f32.mrf.mxu1 }
 0xc3d   :  { %v5191_v48 = vpop.f32.mrf.mxu0  ;;  %v5197_v50 = vpop.f32.mrf.mxu1 }
 0xc3f   :  { %v3629_v1 = vpop.f32.mrf.mxu0  ;;  %3783 = vmax.xlane.f32.xlu0 %v3782_v0  ;;  %v3675_v60 = vpop.f32.mrf.mxu1 }
 0xc40   :  { %v3630_v9 = vadd.f32 %v5449_v62, %v3629_v1  ;;  %v3676_v14 = vadd.f32 %v5450_v11, %v3675_v60 }
 0xc41   :  { %v5202_v16 = vpop.f32.mrf.mxu0  ;;  %v5208_v18 = vpop.f32.mrf.mxu1 }
 0xc42   :  { %v3785_v15 = vsel %vm1040_vm2, %v3630_v9, -inf  ;;  %v3788_v21 = vsel %vm1040_vm2, %v3676_v14, -inf }
 0xc43   :  { %v3632_v57 = vpop.f32.mrf.mxu0  ;;  %3786 = vmax.xlane.f32.xlu1 %v3785_v15  ;;  %3789 = vmax.xlane.f32.xlu0 %v3788_v21  ;;  %v3678_v2 = vpop.f32.mrf.mxu1 }
 0xc45   :  { %v5203_v26 = vpop.f32.mrf.mxu0  ;;  %v5209_v27 = vpop.f32.mrf.mxu1 }
 0xc47   :  { %v3721_v20 = vpop.f32.mrf.mxu0  ;;  %v3767_v3 = vpop.f32.mrf.mxu1 }
 0xc48   :  { %v6296_v29 = vadd.f32 %v5451_v5, %v3721_v20  ;;  %v6301_v31 = vadd.f32 %v5452_v30, %v3767_v3 }
 0xc49   :  { %v5214_v38 = vpop.f32.mrf.mxu0  ;;  %v5220_v40 = vpop.f32.mrf.mxu1 }
 0xc4a   :  { %v3791_v44 = vsel %vm1040_vm2, %v6296_v29, -inf  ;;  %v3794_v45 = vsel %vm1040_vm2, %v6301_v31, -inf }
 0xc4b   :  { %v3724_v8 = vpop.f32.mrf.mxu0  ;;  %3792 = vmax.xlane.f32.xlu1 %v3791_v44  ;;  %3795 = vmax.xlane.f32.xlu0 %v3794_v45  ;;  %v3770_v13 = vpop.f32.mrf.mxu1 }
 0xc4d   :  { %v5215_v51 = vpop.f32.mrf.mxu0  ;;  %v5221_v23 = vpop.f32.mrf.mxu1 }
 0xc5c   :  { %3109 = vrot.lane.b32.xlu1 %v6084_v25, %s5483_s23 }
 0xc60   :  { %3113 = vrot.lane.b32.xlu1 %v6092_v59, %s5483_s23 }
 0xc61   :  { %3105 = vrot.lane.b32.xlu0 %v6086_v58, %s5483_s23 }
 0xc64   :  { %3103 = vrot.lane.b32.xlu1 %v6074_v56, %s5483_s23 }
 0xcbc   :  { %v3775_v42 = vpop.xlane.xlu0 %3774  ;;  %v3778_v52 = vpop.xlane.xlu1 %3777 }
 0xcbd   :  { %v3797_v28 = vsub.f32 %v6266_v35, %v3775_v42  ;;  %v3798_v34 = vsub.f32 %v6271_v24, %v3778_v52 }
 0xcbf   :  { %v3805_v53 = vmul.f32 1.442695, %v3797_v28  ;;  %v3807_v12 = vmul.f32 1.442695, %v3798_v34 }
 0xcc1   :  { %5405 = vpow2.f32 %v3805_v53 }
 0xcc2   :  { %5407 = vpow2.f32 %v3807_v12 }
 0xcc4   :  { %v3781_v25 = vpop.xlane.xlu0 %3780 }
 0xcc5   :  { %v3799_v4 = vsub.f32 %v3538_v22, %v3781_v25 }
 0xcc7   :  { %v3809_v59 = vmul.f32 1.442695, %v3799_v4 }
 0xcc8   :  { %v3784_v10 = vpop.xlane.xlu0 %3783 }
 0xcc9   :  { %5409 = vpow2.f32 %v3809_v59  ;;  %v3800_v58 = vsub.f32 %v3584_v33, %v3784_v10 }
 0xccb   :  { %v3811_v39 = vmul.f32 1.442695, %v3800_v58 }
 0xccc   :  { %v3787_v46 = vpop.xlane.xlu1 %3786  ;;  %v3790_v56 = vpop.xlane.xlu0 %3789 }
 0xccd   :  { %5411 = vpow2.f32 %v3811_v39  ;;  %v3801_v49 = vsub.f32 %v3630_v9, %v3787_v46  ;;  %v3802_v41 = vsub.f32 %v3676_v14, %v3790_v56 }
 0xcce   :  { %v6317_v54 = vpop.eup %5405 }
 0xccf   :  { %v6319_v35 = vpop.eup %5407  ;;  %v3813_v24 = vmul.f32 1.442695, %v3801_v49  ;;  %v3815_v36 = vmul.f32 1.442695, %v3802_v41  ;;  %v3821_v6 = vsel %vm1040_vm2, %v6317_v54, 0.0 }
 0xcd0   :  { %3822 = vadd.xlane.f32.xlu1 %v3821_v6  ;;  %v3824_v22 = vsel %vm1040_vm2, %v6319_v35, 0.0 }
 0xcd1   :  { %5413 = vpow2.f32 %v3813_v24  ;;  %3825 = vadd.xlane.f32.xlu0 %v3824_v22 }
 0xcd2   :  { %5415 = vpow2.f32 %v3815_v36 }
 0xcd4   :  { %v6325_v33 = vpop.xlane.xlu1 %3792  ;;  %v6329_v48 = vpop.xlane.xlu0 %3795 }
 0xcd6   :  { %v6327_v55 = vpop.eup %5409 }
 0xcd7   :  { %v3827_v50 = vsel %vm1040_vm2, %v6327_v55, 0.0 }
 0xcd8   :  { %v3110_v0 = vpop.permute.xlu1 %3109  ;;  %3828 = vadd.xlane.f32.xlu0 %v3827_v50  ;;  %v3106_v11 = vpop.permute.xlu0 %3105 }
 0xcd9   :  { %v3125_v60 = vcombine.low %v3102_v17, %v3110_v0  ;;  %v3126_v62 = vcombine.high %v3102_v17, %v3110_v0  ;;  %v3803_v0 = vsub.f32 %v6296_v29, %v6325_v33 }
 0xcda   :  { %v6333_v1 = vpop.eup %5411 }
 0xcdb   :  { %v3830_v9 = vsel %vm1040_vm2, %v6333_v1, 0.0  ;;  %v3133_v21 = vrot.slane %v3125_v60, %v5586_v37  ;;  %v3140_v2 = vrot.slane %v3126_v62, %v5586_v37  ;;  %v3817_v60 = vmul.f32 1.442695, %v3803_v0 }
 0xcdc   :  { %v3114_v14 = vpop.permute.xlu1 %3113  ;;  %3831 = vadd.xlane.f32.xlu1 %v3830_v9 }
 0xcdd   :  { %v3141_v16 = vcombine.low %v3106_v11, %v3114_v14  ;;  %v3142_v18 = vcombine.high %v3106_v11, %v3114_v14 }
 0xcde   :  { %v6337_v15 = vpop.eup %5413 }
 0xcdf   :  { %v6340_v57 = vpop.eup %5415  ;;  %v3149_v26 = vrot.slane %v3141_v16, %v5586_v37  ;;  %v3156_v27 = vrot.slane %v3142_v18, %v5586_v37  ;;  %v3833_v20 = vsel %vm1040_vm2, %v6337_v15, 0.0 }
 0xce0   :  { %3834 = vadd.xlane.f32.xlu0 %v3833_v20  ;;  %v3836_v40 = vsel %vm1040_vm2, %v6340_v57, 0.0 }
 0xce1   :  { %v3157_v3 = vcombine.low %v3133_v21, %v3149_v26  ;;  %v3158_v5 = vcombine.high %v3133_v21, %v3149_v26  ;;  %v3173_v30 = vcombine.low %v3140_v2, %v3156_v27  ;;  %v3174_v38 = vcombine.high %v3140_v2, %v3156_v27 }
 0xce3   :  { %v3165_v44 = vrot.slane %v3157_v3, %v5591_v43  ;;  %v3172_v45 = vrot.slane %v3158_v5, %v5591_v43  ;;  %v3181_v8 = vrot.slane %v3173_v30, %v5591_v43  ;;  %v3188_v13 = vrot.slane %v3174_v38, %v5591_v43 }
 0xce4   :  { %3837 = vadd.xlane.f32.xlu0 %v3836_v40 }
 0xce5   :  { %v3261_v51 = vcombine.low %v3165_v44, %v3172_v45  ;;  %v4888_v23 = vcombine.high %v3165_v44, %v3172_v45  ;;  %v3277_v17 = vcombine.low %v3181_v8, %v3188_v13  ;;  %v4889_v42 = vcombine.high %v3181_v8, %v3188_v13 }
 0xce7   :  { %v3268_v52 = vrot.slane %v3261_v51, %v5586_v37  ;;  %v3276_v28 = vrot.slane %v4888_v23, %v5586_v37  ;;  %v3284_v34 = vrot.slane %v3277_v17, %v5586_v37  ;;  %v3292_v53 = vrot.slane %v4889_v42, %v5586_v37 }
 0xce9   :  { %v3293_v12 = vcombine.low %v3268_v52, %v3276_v28  ;;  %v3309_v25 = vcombine.low %v3284_v34, %v3292_v53  ;;  %v3294_v4 = vcombine.high %v3268_v52, %v3276_v28  ;;  %v3310_v59 = vcombine.high %v3284_v34, %v3292_v53 }
 0xceb   :  { %v3301_v10 = vrot.slane %v3293_v12, %v5591_v43  ;;  %v3317_v58 = vrot.slane %v3309_v25, %v5591_v43  ;;  %v3308_v39 = vrot.slane %v3294_v4, %v5591_v43  ;;  %v3324_v46 = vrot.slane %v3310_v59, %v5591_v43 }
 0xced   :  { %3111 = vrot.lane.b32.xlu1 %v6098_v61, %s5483_s23  ;;  %v3325_v56 = vcombine.low %v3301_v10, %v3317_v58  ;;  %v3326_v49 = vcombine.high %v3301_v10, %v3317_v58  ;;  %v3327_v41 = vcombine.low %v3308_v39, %v3324_v46  ;;  %v3328_v24 = vcombine.high %v3308_v39, %v3324_v46 }
 0xcee   :  { %v3804_v61 = vsub.f32 %v6301_v31, %v6329_v48  ;;  %v3104_v31 = vpop.permute.xlu1 %3103 }
 0xcef   :  { %v3397_v36 = vpack.c.bf16 %v3325_v56, %v3325_v56  ;;  %v3398_v6 = vpack.c.bf16 %v3326_v49, %v3326_v49  ;;  %v3399_v2 = vpack.c.bf16 %v3327_v41, %v3327_v41  ;;  %v3400_v20 = vpack.c.bf16 %v3328_v24, %v3328_v24 }
 0xcf1   :  { %3115 = vrot.lane.b32.xlu1 %v6106_v63, %s5483_s23  ;;  %v3873_v22 = vsel %vm1508_vm3, %v3397_v36, 0  ;;  %v3919_v50 = vsel %vm1508_vm3, %v3398_v6, 0  ;;  %v3819_v63 = vmul.f32 1.442695, %v3804_v61  ;;  %v3965_v38 = vsel %vm1508_vm3, %v3399_v2, 0 }
 0xcf2   :  { %5223 = vmatpush3.bf16.msra.mxu0 %v3873_v22  ;;  %5229 = vmatpush3.bf16.msra.mxu1 %v3919_v50  ;;  %v4011_v40 = vsel %vm1508_vm3, %v3400_v20, 0 }
 0xcf3   :  { %5234 = vmatprep.subr.bf16.mxu0 %v5475_v7  ;;  %5240 = vmatprep.subr.bf16.mxu1 %v5475_v7  ;;  %5417 = vpow2.f32 %v3819_v63 }
 0xcf4   :  { %5419 = vpow2.f32 %v3817_v60 }
 0xcfa   :  { %3107 = vrot.lane.b32.xlu0 %v6100_v47, %s5483_s23 }
 0xd00   :  { %v6375_v62 = vpop.eup %5417 }
 0xd01   :  { %v3842_v9 = vsel %vm1040_vm2, %v6375_v62, 0.0  ;;  %v6379_v11 = vpop.eup %5419 }
 0xd02   :  { %v3839_v47 = vsel %vm1040_vm2, %v6379_v11, 0.0 }
 0xd15   :  { %3843 = vadd.xlane.f32.xlu1 %v3842_v9 }
 0xd19   :  { %3840 = vadd.xlane.f32.xlu0 %v3839_v47 }
 0xd59   :  { %v3823_v48 = vpop.xlane.xlu1 %3822 }
 0xd5a   :  { %5421 = vrcp.f32 %v3823_v48  ;;  %v3826_v29 = vpop.xlane.xlu0 %3825 }
 0xd5b   :  { %5423 = vrcp.f32 %v3826_v29 }
 0xd61   :  { %v3829_v33 = vpop.xlane.xlu0 %3828 }
 0xd62   :  { %5425 = vrcp.f32 %v3829_v33 }
 0xd65   :  { %v3832_v14 = vpop.xlane.xlu1 %3831 }
 0xd66   :  { %5427 = vrcp.f32 %v3832_v14 }
 0xd67   :  { %v5422_v16 = vpop.eup %5421 }
 0xd68   :  { %v5424_v18 = vpop.eup %5423  ;;  %v3853_v21 = vmul.f32 %v5422_v16, %v6317_v54 }
 0xd69   :  { %v3835_v26 = vpop.xlane.xlu0 %3834  ;;  %v3854_v27 = vmul.f32 %v5424_v18, %v6319_v35  ;;  %v3112_v5 = vpop.permute.xlu1 %3111 }
 0xd6a   :  { %v3861_v3 = vpack.c.bf16 %v3853_v21, %v3853_v21  ;;  %v3193_v35 = vcombine.low %v3104_v31, %v3112_v5  ;;  %v3194_v45 = vcombine.high %v3104_v31, %v3112_v5  ;;  %5429 = vrcp.f32 %v3835_v26 }
 0xd6b   :  { %v3862_v30 = vpack.c.bf16 %v3854_v27, %v3854_v27 }
 0xd6c   :  { %5225 = vmatmul.mubr.msk.bf16.vlgmr.msra.gmra.mxu0 %vm1040_vm2, %v3861_v3  ;;  %v3201_v28 = vrot.slane %v3193_v35, %v5586_v37  ;;  %v3208_v34 = vrot.slane %v3194_v45, %v5586_v37 }
 0xd6d   :  { %5231 = vmatmul.mubr.msk.bf16.vlgmr.msra.gmra.mxu1 %vm1040_vm2, %v3862_v30  ;;  %5235 = vmatpush3.bf16.msra.mxu0 %v3965_v38  ;;  %v3838_v44 = vpop.xlane.xlu0 %3837  ;;  %v3116_v13 = vpop.permute.xlu1 %3115 }
 0xd6e   :  { %5241 = vmatpush3.bf16.msra.mxu1 %v4011_v40  ;;  %5236 = vmatprep.mubr.msk.bf16.mxu0 %vm5476_vm1, %v5475_v7  ;;  %5431 = vrcp.f32 %v3838_v44 }
 0xd6f   :  { %v5426_v54 = vpop.eup %5425  ;;  %5242 = vmatprep.mubr.msk.bf16.mxu1 %vm5476_vm1, %v5475_v7  ;;  %5246 = vmatprep.subr.bf16.mxu0 %v5475_v7 }
 0xd70   :  { %v3855_v8 = vmul.f32 %v5426_v54, %v6327_v55  ;;  %5252 = vmatprep.subr.bf16.mxu1 %v5475_v7 }
 0xd71   :  { %v3108_v51 = vpop.permute.xlu0 %3107 }
 0xd72   :  { %v3209_v23 = vcombine.low %v3108_v51, %v3116_v13  ;;  %v3210_v17 = vcombine.high %v3108_v51, %v3116_v13  ;;  %v3863_v42 = vpack.c.bf16 %v3855_v8, %v3855_v8 }
 0xd73   :  { %v5428_v52 = vpop.eup %5427 }
 0xd74   :  { %v3217_v53 = vrot.slane %v3209_v23, %v5586_v37  ;;  %v3224_v12 = vrot.slane %v3210_v17, %v5586_v37  ;;  %5237 = vmatmul.mubr.msk.bf16.vlgmr.msra.gmra.mxu0 %vm1040_vm2, %v3863_v42  ;;  %v3856_v55 = vmul.f32 %v5428_v52, %v6333_v1 }
 0xd75   :  { %5248 = vmatprep.mubr.msk.bf16.mxu0 %vm5476_vm1, %v5475_v7 }
 0xd76   :  { %v3225_v25 = vcombine.low %v3201_v28, %v3217_v53  ;;  %v3226_v4 = vcombine.high %v3201_v28, %v3217_v53  ;;  %v3241_v59 = vcombine.low %v3208_v34, %v3224_v12  ;;  %v3242_v10 = vcombine.high %v3208_v34, %v3224_v12 }
 0xd77   :  { %v3864_v58 = vpack.c.bf16 %v3856_v55, %v3856_v55  ;;  %v5430_v47 = vpop.eup %5429 }
 0xd78   :  { %v3233_v39 = vrot.slane %v3225_v25, %v5591_v43  ;;  %v3240_v46 = vrot.slane %v3226_v4, %v5591_v43  ;;  %v3249_v56 = vrot.slane %v3241_v59, %v5591_v43  ;;  %v3256_v49 = vrot.slane %v3242_v10, %v5591_v43 }
 0xd79   :  { %5243 = vmatmul.mubr.msk.bf16.vlgmr.msra.gmra.mxu1 %vm1040_vm2, %v3864_v58  ;;  %v3857_v20 = vmul.f32 %v5430_v47, %v6337_v15 }
 0xd7a   :  { %v3329_v41 = vcombine.low %v3233_v39, %v3240_v46  ;;  %v4890_v1 = vcombine.high %v3233_v39, %v3240_v46  ;;  %v3345_v24 = vcombine.low %v3249_v56, %v3256_v49  ;;  %v4891_v36 = vcombine.high %v3249_v56, %v3256_v49  ;;  %5254 = vmatprep.mubr.msk.bf16.mxu1 %vm5476_vm1, %v5475_v7 }
 0xd7b   :  { %v5432_v14 = vpop.eup %5431  ;;  %v3865_v44 = vpack.c.bf16 %v3857_v20, %v3857_v20 }
 0xd7c   :  { %v3336_v6 = vrot.slane %v3329_v41, %v5586_v37  ;;  %v3344_v22 = vrot.slane %v4890_v1, %v5586_v37  ;;  %v3352_v50 = vrot.slane %v3345_v24, %v5586_v37  ;;  %v3360_v61 = vrot.slane %v4891_v36, %v5586_v37 }
 0xd7d   :  { %v3858_v3 = vmul.f32 %v5432_v14, %v6340_v57 }
 0xd7e   :  { %v3361_v0 = vcombine.low %v3336_v6, %v3344_v22  ;;  %v3377_v63 = vcombine.low %v3352_v50, %v3360_v61  ;;  %v3362_v60 = vcombine.high %v3336_v6, %v3344_v22  ;;  %v3378_v9 = vcombine.high %v3352_v50, %v3360_v61 }
 0xd7f   :  { %v3866_v54 = vpack.c.bf16 %v3858_v3, %v3858_v3 }
 0xd80   :  { %v3369_v31 = vrot.slane %v3361_v0, %v5591_v43  ;;  %v3385_v48 = vrot.slane %v3377_v63, %v5591_v43  ;;  %v3376_v29 = vrot.slane %v3362_v60, %v5591_v43  ;;  %v3392_v33 = vrot.slane %v3378_v9, %v5591_v43 }
 0xd82   :  { %v3393_v16 = vcombine.low %v3369_v31, %v3385_v48  ;;  %v3394_v18 = vcombine.high %v3369_v31, %v3385_v48  ;;  %v3395_v21 = vcombine.low %v3376_v29, %v3392_v33  ;;  %v3396_v2 = vcombine.high %v3376_v29, %v3392_v33 }
 0xd84   :  { %v3401_v26 = vpack.c.bf16 %v3393_v16, %v3393_v16  ;;  %v3402_v27 = vpack.c.bf16 %v3394_v18, %v3394_v18  ;;  %v3403_v38 = vpack.c.bf16 %v3395_v21, %v3395_v21  ;;  %v3404_v40 = vpack.c.bf16 %v3396_v2, %v3396_v2 }
 0xd86   :  { %v4057_v5 = vsel %vm1508_vm3, %v3401_v26, 0  ;;  %v4103_v30 = vsel %vm1508_vm3, %v3402_v27, 0  ;;  %v4149_v15 = vsel %vm1508_vm3, %v3403_v38, 0  ;;  %v4195_v57 = vsel %vm1508_vm3, %v3404_v40, 0 }
 0xd87   :  { %5247 = vmatpush3.bf16.msra.mxu0 %v4057_v5  ;;  %5253 = vmatpush3.bf16.msra.mxu1 %v4103_v30 }
 0xd88   :  { %5258 = vmatprep.subr.bf16.mxu0 %v5475_v7  ;;  %5264 = vmatprep.subr.bf16.mxu1 %v5475_v7 }
 0xd8a   :  { %5249 = vmatmul.mubr.msk.bf16.vlgmr.msra.gmra.mxu0 %vm1040_vm2, %v3865_v44  ;;  %5255 = vmatmul.mubr.msk.bf16.vlgmr.msra.gmra.mxu1 %vm1040_vm2, %v3866_v54 }
 0xd8b   :  { %5259 = vmatpush3.bf16.msra.mxu0 %v4149_v15  ;;  %5265 = vmatpush3.bf16.msra.mxu1 %v4195_v57 }
 0xd8c   :  { %5266 = vmatprep.mubr.msk.bf16.mxu1 %vm5476_vm1, %v5475_v7  ;;  %5260 = vmatprep.mubr.msk.bf16.mxu0 %vm5476_vm1, %v5475_v7 }
 0xd8d   :  { %5270 = vmatprep.subr.bf16.mxu0 %v5475_v7  ;;  %5278 = vmatprep.subr.bf16.mxu1 %v5475_v7 }
 0xd9e   :  { %v3844_v35 = vpop.xlane.xlu1 %3843 }
 0xd9f   :  { %5433 = vrcp.f32 %v3844_v35 }
 0xda2   :  { %v3841_v45 = vpop.xlane.xlu0 %3840 }
 0xda3   :  { %5435 = vrcp.f32 %v3841_v45 }
 0xdac   :  { %v5434_v8 = vpop.eup %5433 }
 0xdad   :  { %v3860_v13 = vmul.f32 %v5434_v8, %v6375_v62 }
 0xdaf   :  { %v3868_v51 = vpack.c.bf16 %v3860_v13, %v3860_v13 }
 0xdb0   :  { %v5436_v23 = vpop.eup %5435 }
 0xdb1   :  { %5267 = vmatmul.mubr.msk.bf16.vlgmr.msra.gmra.mxu1 %vm1040_vm2, %v3868_v51  ;;  %v3859_v17 = vmul.f32 %v5436_v23, %v6379_v11 }
 0xdb2   :  { %5282 = vmatprep.mubr.msk.bf16.mxu1 %vm5476_vm1, %v5475_v7 }
 0xdb3   :  { %v3867_v42 = vpack.c.bf16 %v3859_v17, %v3859_v17 }
 0xdb5   :  { %5261 = vmatmul.mubr.msk.bf16.vlgmr.msra.gmra.mxu0 %vm1040_vm2, %v3867_v42 }
 0xdb6   :  { %5274 = vmatprep.mubr.msk.bf16.mxu0 %vm5476_vm1, %v5475_v7 }
 0xe2c   :  { %v3909_v52 = vpop.f32.mrf.mxu0 }
 0xe2d   :  { %v3955_v28 = vpop.f32.mrf.mxu1 }
 0xe2e   :  { %v5226_v34 = vpop.f32.mrf.mxu0 }
 0xe2f   :  { %v5232_v53 = vpop.f32.mrf.mxu1 }
 0xe30   :  { %v3912_v62 = vpop.f32.mrf.mxu0 }
 0xe31   :  { %v3958_v12 = vpop.f32.mrf.mxu1 }
 0xe32   :  { %v5227_v55 = vpop.f32.mrf.mxu0 }
 0xe33   :  { %v5233_v25 = vpop.f32.mrf.mxu1 }
 0xe34   :  { %v4001_v4 = vpop.f32.mrf.mxu0 }
 0xe35   :  { %v4237_v59 = vcombine.low %v3909_v52, %v4001_v4  ;;  %v4238_v11 = vcombine.high %v3909_v52, %v4001_v4 }
 0xe36   :  { %v5238_v10 = vpop.f32.mrf.mxu0 }
 0xe37   :  { %v4245_v1 = vrot.slane %v4237_v59, %v5586_v37  ;;  %v4252_v24 = vrot.slane %v4238_v11, %v5586_v37 }
 0xe38   :  { %v4004_v58 = vpop.f32.mrf.mxu0 }
 0xe39   :  { %v4047_v39 = vpop.f32.mrf.mxu1 }
 0xe3a   :  { %v4253_v46 = vcombine.low %v3955_v28, %v4047_v39  ;;  %v4254_v56 = vcombine.high %v3955_v28, %v4047_v39  ;;  %v5239_v49 = vpop.f32.mrf.mxu0 }
 0xe3b   :  { %v5244_v41 = vpop.f32.mrf.mxu1 }
 0xe3c   :  { %v4261_v36 = vrot.slane %v4253_v46, %v5586_v37  ;;  %v4268_v6 = vrot.slane %v4254_v56, %v5586_v37 }
 0xe3d   :  { %v4050_v22 = vpop.f32.mrf.mxu1 }
 0xe3e   :  { %v4269_v50 = vcombine.low %v4245_v1, %v4261_v36  ;;  %v4270_v61 = vcombine.high %v4245_v1, %v4261_v36  ;;  %v4285_v0 = vcombine.low %v4252_v24, %v4268_v6  ;;  %v4286_v63 = vcombine.high %v4252_v24, %v4268_v6 }
 0xe3f   :  { %v5245_v60 = vpop.f32.mrf.mxu1 }
 0xe40   :  { %v4277_v9 = vrot.slane %v4269_v50, %v5591_v43  ;;  %v4284_v47 = vrot.slane %v4270_v61, %v5591_v43  ;;  %v4293_v31 = vrot.slane %v4285_v0, %v5591_v43  ;;  %v4300_v48 = vrot.slane %v4286_v63, %v5591_v43 }
 0xe42   :  { %v4373_v29 = vcombine.low %v4277_v9, %v4284_v47  ;;  %v4908_v33 = vcombine.high %v4277_v9, %v4284_v47  ;;  %v4389_v14 = vcombine.low %v4293_v31, %v4300_v48  ;;  %v4909_v16 = vcombine.high %v4293_v31, %v4300_v48  ;;  %v5353_v47 = vld [vmem:[%s6558_s3 + $0x18] sm:$0xff]  }
 0xe43   :  { %5271 = vmatpush3.bf16.msra.mxu0 %v5353_v47 }
 0xe44   :  { %v4380_v18 = vrot.slane %v4373_v29, %v5586_v37  ;;  %v4388_v21 = vrot.slane %v4908_v33, %v5586_v37  ;;  %v4396_v2 = vrot.slane %v4389_v14, %v5586_v37  ;;  %v4404_v26 = vrot.slane %v4909_v16, %v5586_v37  ;;  %5272 = vmatprep.subr.bf16.mxu0 %v5475_v7 }
 0xe46   :  { %v4406_v27 = vcombine.high %v4380_v18, %v4388_v21  ;;  %v4422_v20 = vcombine.high %v4396_v2, %v4404_v26  ;;  %v4405_v3 = vcombine.low %v4380_v18, %v4388_v21  ;;  %v4421_v5 = vcombine.low %v4396_v2, %v4404_v26 }
 0xe48   :  { %v6456_v30 = vrot.slane %v4406_v27, %v5591_v43  ;;  %v6459_v38 = vrot.slane %v4422_v20, %v5591_v43  ;;  %v6462_v40 = vrot.slane %v4405_v3, %v5591_v43  ;;  %v6465_v44 = vrot.slane %v4421_v5, %v5591_v43  ;;  %v5354_v3 = vld [vmem:[%s6558_s3 + $0x10] sm:$0xff]  }
 0xe49   :  { %5273 = vmatpush3.bf16.msra.mxu0 %v5354_v3 }
 0xe4a   :  { %v4093_v54 = vpop.f32.mrf.mxu0  ;;  %v4139_v15 = vpop.f32.mrf.mxu1  ;;  %v4439_v57 = vcombine.low %v6456_v30, %v6459_v38  ;;  %v4437_v35 = vcombine.low %v6462_v40, %v6465_v44  ;;  %v4438_v45 = vcombine.high %v6462_v40, %v6465_v44  ;;  %v4440_v8 = vcombine.high %v6456_v30, %v6459_v38  ;;  %5286 = vmatprep.subr.bf16.mxu0 %v5475_v7 }
 0xe4c   :  { %v5250_v13 = vpop.f32.mrf.mxu0  ;;  %v5256_v51 = vpop.f32.mrf.mxu1 }
 0xe4e   :  { %v4096_v23 = vpop.f32.mrf.mxu0  ;;  %v4142_v17 = vpop.f32.mrf.mxu1 }
 0xe50   :  { %v5251_v42 = vpop.f32.mrf.mxu0  ;;  %v5257_v52 = vpop.f32.mrf.mxu1 }
 0xe71   :  { %v4231_v28 = vpop.f32.mrf.mxu1 }
 0xe72   :  { %v4321_v53 = vcombine.low %v4139_v15, %v4231_v28  ;;  %v4322_v62 = vcombine.high %v4139_v15, %v4231_v28 }
 0xe73   :  { %v5268_v34 = vpop.f32.mrf.mxu1 }
 0xe74   :  { %v4329_v10 = vrot.slane %v4321_v53, %v5586_v37  ;;  %v4336_v58 = vrot.slane %v4322_v62, %v5586_v37 }
 0xe75   :  { %v4185_v12 = vpop.f32.mrf.mxu0  ;;  %v4234_v55 = vpop.f32.mrf.mxu1 }
 0xe76   :  { %v4305_v25 = vcombine.low %v4093_v54, %v4185_v12  ;;  %v4306_v4 = vcombine.high %v4093_v54, %v4185_v12 }
 0xe77   :  { %v5262_v59 = vpop.f32.mrf.mxu0  ;;  %v5269_v11 = vpop.f32.mrf.mxu1 }
 0xe78   :  { %v4313_v39 = vrot.slane %v4305_v25, %v5586_v37  ;;  %v4320_v46 = vrot.slane %v4306_v4, %v5586_v37 }
 0xe79   :  { %v4188_v56 = vpop.f32.mrf.mxu0 }
 0xe7a   :  { %v4337_v49 = vcombine.low %v4313_v39, %v4329_v10  ;;  %v4338_v41 = vcombine.high %v4313_v39, %v4329_v10  ;;  %v4353_v1 = vcombine.low %v4320_v46, %v4336_v58  ;;  %v4354_v24 = vcombine.high %v4320_v46, %v4336_v58  ;;  %v5355_v56 = vld [vmem:[%s6559_s4 + $0x18] sm:$0xff]  }
 0xe7b   :  { %v5263_v36 = vpop.f32.mrf.mxu0  ;;  %5279 = vmatpush3.bf16.msra.mxu1 %v5355_v56 }
 0xe7c   :  { %v4345_v6 = vrot.slane %v4337_v49, %v5591_v43  ;;  %v4352_v22 = vrot.slane %v4338_v41, %v5591_v43  ;;  %v4361_v50 = vrot.slane %v4353_v1, %v5591_v43  ;;  %v4368_v61 = vrot.slane %v4354_v24, %v5591_v43  ;;  %5280 = vmatprep.subr.bf16.mxu1 %v5475_v7  ;;  %v5358_v49 = vld [vmem:[%s6560_s5 + $0x30] sm:$0xff]  }
 0xe7e   :  { %v4441_v0 = vcombine.low %v4345_v6, %v4352_v22  ;;  %v4910_v63 = vcombine.high %v4345_v6, %v4352_v22  ;;  %v4457_v60 = vcombine.low %v4361_v50, %v4368_v61  ;;  %v4911_v9 = vcombine.high %v4361_v50, %v4368_v61 }
 0xe80   :  { %v4448_v31 = vrot.slane %v4441_v0, %v5586_v37  ;;  %v4456_v48 = vrot.slane %v4910_v63, %v5586_v37  ;;  %v4464_v29 = vrot.slane %v4457_v60, %v5586_v37  ;;  %v4472_v33 = vrot.slane %v4911_v9, %v5586_v37  ;;  %v4920_v63 = vld [vmem:[%s6562_s7 + $0x1] ss:$0 sm:$0xff] }
 0xe82   :  { %v4474_v14 = vcombine.high %v4448_v31, %v4456_v48  ;;  %v4490_v16 = vcombine.high %v4464_v29, %v4472_v33  ;;  %v4473_v18 = vcombine.low %v4448_v31, %v4456_v48  ;;  %v4489_v21 = vcombine.low %v4464_v29, %v4472_v33  ;;  %v5359_v48 = vld [vmem:[%s6560_s5 + $0x28] sm:$0xff]   ;;  %v5360_v29 = vld [vmem:[%s6560_s5 + $0x20] sm:$0xff]  }
 0xe84   :  { %v4488_v2 = vrot.slane %v4474_v14, %v5591_v43  ;;  %v4504_v26 = vrot.slane %v4490_v16, %v5591_v43  ;;  %v4481_v27 = vrot.slane %v4473_v18, %v5591_v43  ;;  %v4497_v20 = vrot.slane %v4489_v21, %v5591_v43 }
 0xe86   :  { %v4507_v37 = vcombine.low %v4488_v2, %v4504_v26  ;;  %v4506_v5 = vcombine.high %v4481_v27, %v4497_v20  ;;  %v4505_v30 = vcombine.low %v4481_v27, %v4497_v20  ;;  %v4508_v15 = vcombine.high %v4488_v2, %v4504_v26 }
 0xe88   :  { %v5331_v38 = vpack.i.bf16 %v4507_v37, %v4439_v57  ;;  %v5326_v54 = vpack.i.bf16 %v4506_v5, %v4438_v45  ;;  %v5336_v13 = vpack.i.bf16 %v4508_v15, %v4440_v8 }
 0xe8a   :  { %5332 = vrot.lane.b32.xlu1 %v5331_v38, %s5484_s28  ;;  %5327 = vrot.lane.b32.xlu0 %v5326_v54, %s5485_s29 }
 0xe8e   :  { %5337 = vrot.lane.b32.xlu0 %v5336_v13, %s5486_s30 }
 0xefc   :  { %v5333_v43 = vpop.permute.xlu1 %5332  ;;  %v5328_v51 = vpop.permute.xlu0 %5327 }
 0xefd   :  { %v5330_v23 = vunpack.i.h.bf16 %v5328_v51  ;;  %v5329_v17 = vunpack.i.l.bf16 %v5328_v51  ;;  %v5335_v42 = vunpack.i.h.bf16 %v5333_v43  ;;  %v5334_v52 = vunpack.i.l.bf16 %v5333_v43 }
 0xeff   :  { %v4533_v57 = vsel %vm1040_vm2, %v4437_v35, %v5329_v17  ;;  %v4534_v45 = vsel %vm1040_vm2, %v4505_v30, %v5330_v23 }
 0xf00   :  { %v5338_v28 = vpop.permute.xlu0 %5337  ;;  %v4535_v8 = vsel %vm2172_vm4, %v4533_v57, %v5334_v52  ;;  %v4536_v62 = vsel %vm2172_vm4, %v4534_v45, %v5335_v42  ;;  %v4941_v45 = vld [vmem:[%s6563_s8] ss:$0 sm:$0xff] }
 0xf01   :  { %v5340_v34 = vunpack.i.h.bf16 %v5338_v28  ;;  %v5339_v53 = vunpack.i.l.bf16 %v5338_v28 }
 0xf03   :  { %v4537_v12 = vsel %vm2175_vm5, %v4535_v8, %v5339_v53  ;;  %v4538_v55 = vsel %vm2175_vm5, %v4536_v62, %v5340_v34 }
 0xf04   :  { %v4539_v25 = vpack.c.bf16 %v4538_v55, %v4537_v12 }
 0xf06   :  { %5275 = vmatmul.mubr.msk.bf16.vlgmr.msra.gmra.mxu0 %vm47_vm0, %v4539_v25 }
 0xf07   :  { %5294 = vmatprep.mubr.msk.bf16.mxu0 %vm5476_vm1, %v5475_v7 }
 0xfc6   :  { %v4594_v40 = vpop.f32.mrf.mxu0 }
 0xfc7   :  { %v4601_v44 = vadd.f32 %v4594_v40, %v6046_v32  ;;  %v5356_v32 = vld [vmem:[%s6559_s4 + $0x10] sm:$0xff]  }
 0xfc8   :  { %v5276_v35 = vpop.f32.mrf.mxu0  ;;  %5281 = vmatpush3.bf16.msra.mxu1 %v5356_v32 }
 0xfc9   :  { %v4605_v4 = vmul.f32 %v4601_v44, %v4601_v44 }
 0xfca   :  { %v4597_v59 = vpop.f32.mrf.mxu0 }
 0xfcb   :  { %v4602_v11 = vadd.f32 %v4597_v59, %v6050_v19  ;;  %v4607_v10 = vsel %vm47_vm0, %v4605_v4, 0.0  ;;  %v5357_v19 = vld [vmem:[%s6560_s5 + $0x38] sm:$0xff]  }
 0xfcc   :  { %4608 = vadd.xlane.f32.xlu1 %v4607_v10  ;;  %v5277_v58 = vpop.f32.mrf.mxu0  ;;  %5287 = vmatpush3.bf16.msra.mxu0 %v5357_v19 }
 0xfcd   :  { %v4606_v39 = vmul.f32 %v4602_v11, %v4602_v11  ;;  %5288 = vmatprep.subr.bf16.mxu0 %v5475_v7 }
 0xfcf   :  { %v4610_v46 = vsel %vm47_vm0, %v4606_v39, 0.0 }
 0xfd0   :  { %4611 = vadd.xlane.f32.xlu0 %v4610_v46  ;;  %5289 = vmatpush3.bf16.msra.mxu0 %v5358_v49 }
 0xfd1   :  { %5290 = vmatprep.subr.bf16.mxu0 %v5475_v7 }
 0xfd4   :  { %5291 = vmatpush3.bf16.msra.mxu0 %v5359_v48 }
 0xfd5   :  { %5292 = vmatprep.subr.bf16.mxu0 %v5475_v7 }
 0xfd8   :  { %5293 = vmatpush3.bf16.msra.mxu0 %v5360_v29 }
0x1055   :  { %v4609_v41 = vpop.xlane.xlu1 %4608 }
0x1056   :  { %v4613_v1 = vmul.f32 0.03125, %v4609_v41 }
0x1058   :  { %v4615_v24 = vadd.f32 1e-06, %v4613_v1 }
0x1059   :  { %v4612_v36 = vpop.xlane.xlu0 %4611 }
0x105a   :  { %5437 = vrsqrt.f32 %v4615_v24  ;;  %v4614_v6 = vmul.f32 0.03125, %v4612_v36 }
0x105c   :  { %v4616_v22 = vadd.f32 1e-06, %v4614_v6 }
0x105e   :  { %5439 = vrsqrt.f32 %v4616_v22 }
0x1067   :  { %v5438_v50 = vpop.eup %5437 }
0x1068   :  { %v4619_v61 = vmul.f32 %v5438_v50, %v4601_v44 }
0x106a   :  { %v4627_v9 = vmul.f32 %v4920_v63, %v4619_v61 }
0x106b   :  { %v5440_v0 = vpop.eup %5439 }
0x106c   :  { %v4620_v60 = vmul.f32 %v5440_v0, %v4602_v11 }
0x106e   :  { %v4628_v47 = vmul.f32 %v4920_v63, %v4620_v60 }
0x1070   :  { %v4629_v31 = vpack.c.bf16 %v4628_v47, %v4627_v9 }
0x1072   :  { %5283 = vmatmul.mubr.msk.bf16.vlgmr.msra.gmra.mxu1 %vm47_vm0, %v4629_v31 }
0x1132   :  { %v4684_v33 = vpop.f32.mrf.mxu1 }
0x1133   :  { %v4691_v18 = vmax.f32 %v4684_v33, 0.0 }
0x1134   :  { %v5284_v14 = vpop.f32.mrf.mxu1 }
0x1136   :  { %v4687_v16 = vpop.f32.mrf.mxu1 }
0x1137   :  { %v4692_v21 = vmax.f32 %v4687_v16, 0.0 }
0x1138   :  { %v5285_v2 = vpop.f32.mrf.mxu1 }
0x1139   :  { %v4693_v26 = vpack.c.bf16 %v4692_v21, %v4691_v18 }
0x113b   :  { %5295 = vmatmul.mubr.msk.bf16.vlgmr.msra.gmra.mxu0 %vm2362_vm6, %v4693_v26 }
0x11fb   :  { %v4764_v27 = vpop.f32.mrf.mxu0 }
0x11fc   :  { %v4771_v37 = vadd.f32 %v4764_v27, %v4601_v44 }
0x11fd   :  { %v5296_v20 = vpop.f32.mrf.mxu0 }
0x11fe   :  { %v4774_v38 = vmul.f32 %v4771_v37, %v4771_v37 }
0x11ff   :  { %v4767_v3 = vpop.f32.mrf.mxu0 }
0x1200   :  { %v4772_v5 = vadd.f32 %v4767_v3, %v4602_v11 }
0x1201   :  { %v5297_v7 = vpop.f32.mrf.mxu0 }
0x1202   :  { %v4775_v30 = vmul.f32 %v4772_v5, %v4772_v5 }
0x1204   :  { %v4778_v54 = vrot.slane %v4775_v30, 7 }
0x1206   :  { %v4780_v15 = vsel %vm4779_vm7, %v4778_v54, %v4774_v38 }
0x1207   :  { %v4783_v13 = vsel %vm4782_vm8, %v4780_v15, 0.0 }
0x1208   :  { %4784 = vadd.xlane.f32.xlu0 %v4783_v13 }
0x1291   :  { %v4785_v43 = vpop.xlane.xlu0 %4784 }
0x1292   :  { %v4786_v51 = vmul.f32 0.03125, %v4785_v43 }
0x1294   :  { %v4787_v23 = vadd.f32 1e-06, %v4786_v51 }
0x1296   :  { %5441 = vrsqrt.f32 %v4787_v23 }
0x12a3   :  { %v5442_v17 = vpop.eup %5441 }
0x12a4   :  { %v4790_v42 = vrot.slane %v5442_v17, 1  ;;  %v4793_v52 = vmul.f32 %v5442_v17, %v4771_v37 }
0x12a6   :  { %v4794_v57 = vmul.f32 %v4790_v42, %v4772_v5  ;;  %v4801_v34 = vmul.f32 %v4941_v45, %v4793_v52 }
0x12a8   :  { %v4802_v28 = vmul.f32 %v4941_v45, %v4794_v57 }
0x12aa   :  { %v4805_v53 = vrot.slane %v4802_v28, 7 }
0x12ac   :  { %v4806_v8 = vsel %vm4779_vm7, %v4805_v53, %v4801_v34 }
0x12ad   :  { %4808 = vst.msk [vmem:[#allocation2] sm:$0x3] %vm4782_vm8, %v4806_v8 }
0x12ae   :  { %5464 = shalt.err (!%p5461_p4)
}
0x12af   :  { %4818 = dma.vmem_to_hbm [thread:$0]  %s4816_s26, 32, %s6564_s9, [#allocation3]  }
0x12b0   :  { %5473 = dma.done.wait [#allocation3], 32  }
0x12b1   :  { %5474 = vsyncadd [#allocation3], 4294967264 }
0x12b2   :  { %4822 = vsyncpa [#allocation3], 1 }

</bundles_post_ra>
